<compile_context>
chip_gen: v7x
topology: tpu7x:2x2x1
jax: 0.10.0
libtpu: 0.0.40
codegen_flags: <defaults>
</compile_context>

<pallas_src>
import functools
import math

import jax
import jax.numpy as jnp
from jax.experimental import pallas as pl
from jax.experimental.pallas import tpu as pltpu


def _round_up(x, m):
    return (x + m - 1) // m * m


# ----------------------------- Pallas kernel --------------------------------
def fnn_kernel(x_ref, wm_ref, bm_ref, wd_ref, bd_ref, o_ref,
               h_ref, lg_ref, m_ref, l_ref, *, v_actual, v_tile, num_v):
    # x_ref  : [Bt, Kp]      bf16 flattened embeddings (resident across v)
    # wm_ref : [Kp, Hp]      bf16 Middle weight (transposed), whole
    # bm_ref : [1,  Hp]      f32  Middle bias
    # wd_ref : [Hp, Vt]      bf16 decoder1 weight tile (streamed over v)
    # bd_ref : [1,  Vt]      f32  decoder1 bias tile
    # o_ref  : [Bt, Vp]      f32  output slab (resident across v)
    # h_ref  : [Bt, Hp]      f32  scratch: hidden activations
    # lg_ref : [nv, Bt, Vt]  f32  scratch: staged raw logit tiles
    # m_ref  : [Bt, 1]       f32  scratch: running max
    # l_ref  : [Bt, 1]       f32  scratch: running sum-exp
    v = pl.program_id(1)

    @pl.when(v == 0)
    def _():
        h = jnp.dot(x_ref[...], wm_ref[...], preferred_element_type=jnp.float32)
        h_ref[...] = jnp.tanh(h + bm_ref[...])
        # nn.Dropout(0.5) is the identity in eval mode.
        # TODO(synk): training-mode dropout via pltpu.prng_seed + prng_random_bits.
        m_ref[...] = jnp.full_like(m_ref, -jnp.inf)
        l_ref[...] = jnp.zeros_like(l_ref)

    # Decoder tile: logits = h @ Wd[:, tile] + bd[tile]  (bf16 MXU, f32 accum).
    logits_t = jnp.dot(h_ref[...].astype(jnp.bfloat16), wd_ref[...],
                       preferred_element_type=jnp.float32) + bd_ref[...]
    lg_ref[v] = logits_t

    # Online max / sum-exp across vocab tiles; padded columns -> -inf.
    cols = jax.lax.broadcasted_iota(jnp.int32, logits_t.shape, 1) + v * v_tile
    masked = jnp.where(cols < v_actual, logits_t, -jnp.inf)
    m_prev = m_ref[...]
    m_new = jnp.maximum(m_prev, jnp.max(masked, axis=1, keepdims=True))
    l_ref[...] = (l_ref[...] * jnp.exp(m_prev - m_new)
                  + jnp.sum(jnp.exp(masked - m_new), axis=1, keepdims=True))
    m_ref[...] = m_new

    # Finalize: write log-softmax for the whole padded-V slab (lane-dense store).
    @pl.when(v == num_v - 1)
    def _():
        lse = m_ref[...] + jnp.log(l_ref[...])
        for t in range(num_v):  # static unroll -> static lane offsets
            o_ref[:, t * v_tile:(t + 1) * v_tile] = lg_ref[t] - lse


# ------------------------------- wrapper -------------------------------------
def fnn_forward(ids, enc_w, wm, bm, wd, bd, *, b_tile=128, v_tile=256):
    """ids: [B, W] int32.  Linear weights stored transposed ([in, out]) vs.
    nn.Linear.  Returns [B, ntoken] float32 log-probabilities."""
    B, W = ids.shape
    E = enc_w.shape[1]
    K = W * E
    H = wm.shape[1]
    V = wd.shape[1]

    # Embedding gather + flatten (plain JAX glue).
    # TODO(synk): fuse the gather into the kernel (scalar-prefetch ids + row DMA
    # from enc_w kept in HBM) to avoid materializing [B, W*E] in HBM.
    x = jnp.take(enc_w, ids, axis=0).reshape(B, K)

    # Lane-dense padding of every matmul dimension.
    Kp = _round_up(K, 128)
    Hp = _round_up(H, 128)
    Vp = _round_up(V, v_tile)
    Bt = min(b_tile, _round_up(B, 8))
    Bp = _round_up(B, Bt)
    num_v = Vp // v_tile

    x_p = jnp.zeros((Bp, Kp), jnp.bfloat16).at[:B, :K].set(x.astype(jnp.bfloat16))
    wm_p = jnp.zeros((Kp, Hp), jnp.bfloat16).at[:K, :H].set(wm.astype(jnp.bfloat16))
    bm_p = jnp.zeros((1, Hp), jnp.float32).at[:, :H].set(bm.reshape(1, H))
    wd_p = jnp.zeros((Hp, Vp), jnp.bfloat16).at[:H, :V].set(wd.astype(jnp.bfloat16))
    bd_p = jnp.zeros((1, Vp), jnp.float32).at[:, :V].set(bd.reshape(1, V))

    kernel = functools.partial(fnn_kernel, v_actual=V, v_tile=v_tile, num_v=num_v)

    out = pl.pallas_call(
        kernel,
        out_shape=jax.ShapeDtypeStruct((Bp, Vp), jnp.float32),
        grid_spec=pltpu.PrefetchScalarGridSpec(
            num_scalar_prefetch=0,
            grid=(Bp // Bt, num_v),
            in_specs=[
                pl.BlockSpec((Bt, Kp), lambda b, v: (b, 0)),      # x (per batch tile)
                pl.BlockSpec((Kp, Hp), lambda b, v: (0, 0)),      # Wm (resident)
                pl.BlockSpec((1, Hp), lambda b, v: (0, 0)),       # bm
                pl.BlockSpec((Hp, v_tile), lambda b, v: (0, v)),  # Wd (streamed)
                pl.BlockSpec((1, v_tile), lambda b, v: (0, v)),   # bd (streamed)
            ],
            out_specs=pl.BlockSpec((Bt, Vp), lambda b, v: (b, 0)),
            scratch_shapes=[
                pltpu.VMEM((Bt, Hp), jnp.float32),            # h
                pltpu.VMEM((num_v, Bt, v_tile), jnp.float32),  # staged logits
                pltpu.VMEM((Bt, 1), jnp.float32),              # running max
                pltpu.VMEM((Bt, 1), jnp.float32),              # running sum-exp
            ],
        ),
        compiler_params=pltpu.CompilerParams(
            dimension_semantics=("parallel", "arbitrary"),
            # Tiles above are small; raise (with headroom vs. 64 MiB physical on
            # v7x) if b_tile / v_tile are enlarged for realistic vocab sizes.
            vmem_limit_bytes=32 * 1024 * 1024,
        ),
    )(x_p, wm_p, bm_p, wd_p, bd_p)

    return out[:B, :V]


# --------------------------- parameter init ----------------------------------
def xavier_uniform(key, fan_in, fan_out, shape):
    a = math.sqrt(6.0 / (fan_in + fan_out))
    return jax.random.uniform(key, shape, jnp.float32, -a, a)


def init_params(key, ntoken, embedding_size, window_size, hidden_size):
    k1, k2, k3, k4, k5 = jax.random.split(key, 5)
    # encoder.weight: [ntoken, emb]
    enc_w = xavier_uniform(k1, embedding_size, ntoken, (ntoken, embedding_size))
    # Middle: Linear(window*emb -> hidden), stored transposed [in, out]
    fan_in_m = window_size * embedding_size
    wm = xavier_uniform(k2, fan_in_m, hidden_size, (fan_in_m, hidden_size))
    bm = jax.random.uniform(k3, (hidden_size,), jnp.float32,
                            -1.0 / math.sqrt(fan_in_m), 1.0 / math.sqrt(fan_in_m))
    # decoder1: Linear(hidden -> ntoken), stored transposed [in, out]
    wd = xavier_uniform(k4, hidden_size, ntoken, (hidden_size, ntoken))
    bd = jax.random.uniform(k5, (ntoken,), jnp.float32,
                            -1.0 / math.sqrt(hidden_size), 1.0 / math.sqrt(hidden_size))
    return enc_w, wm, bm, wd, bd


if __name__ == "__main__":
    ntoken = 300          # vocab; padded to 512 (2 vocab tiles of 256)
    embedding_size = 16
    window_size = 8       # K = W*E = 128
    hidden_size = 100     # padded to 128
    batch = 200           # padded to 256 -> 2 batch tiles of 128

    key = jax.random.PRNGKey(0)
    kp, kx = jax.random.split(key)
    enc_w, wm, bm, wd, bd = init_params(kp, ntoken, embedding_size,
                                        window_size, hidden_size)
    ids = jax.random.randint(kx, (batch, window_size), 0, ntoken, dtype=jnp.int32)

    logp = fnn_forward(ids, enc_w, wm, bm, wd, bd, b_tile=128, v_tile=256)
    logp = jax.block_until_ready(logp)

    # Pure-JAX f32 reference of the module forward.
    emb_flat = jnp.take(enc_w, ids, axis=0).reshape(batch, window_size * embedding_size)
    hid = jnp.tanh(emb_flat @ wm + bm)
    ref_logp = jax.nn.log_softmax(hid @ wd + bd, axis=1)

    assert logp.shape == (batch, ntoken)
    # Rows of exp(logp) must sum to 1 (exact up to f32 rounding by construction).
    assert bool(jnp.allclose(jnp.exp(logp).sum(axis=1), 1.0, atol=1e-4))
    # Match the reference up to bf16-matmul error.
    assert bool(jnp.allclose(logp, ref_logp, atol=1e-1)), \
        float(jnp.max(jnp.abs(logp - ref_logp)))

    print("KERNEL_OK")
</pallas_src>

<mosaic_0001>
module attributes {stable_mosaic.version = 11 : i64} {
  func.func @fnn_kernel(%arg0: i32, %arg1: i32, %arg2: memref<128x128xbf16, #tpu.memory_space<vmem>>, %arg3: memref<128x128xbf16, #tpu.memory_space<vmem>>, %arg4: memref<1x128xf32, #tpu.memory_space<vmem>>, %arg5: memref<128x256xbf16, #tpu.memory_space<vmem>>, %arg6: memref<1x256xf32, #tpu.memory_space<vmem>>, %arg7: memref<128x512xf32, #tpu.memory_space<vmem>>, %arg8: memref<128x128xf32, #tpu.memory_space<vmem>>, %arg9: memref<2x128x256xf32, #tpu.memory_space<vmem>>, %arg10: memref<128x1xf32, #tpu.memory_space<vmem>>, %arg11: memref<128x1xf32, #tpu.memory_space<vmem>>) attributes {dimension_semantics = [#tpu.dimension_semantics<parallel>, #tpu.dimension_semantics<arbitrary>], iteration_bounds = array<i64: 2, 2>, scalar_prefetch = 0 : i64, scratch_operands = 4 : i64, tpu.core_type = #tpu.core_type<tc>, window_params = [{transform_indices = @transform_0, window_bounds = array<i64: 128, 128>}, {pipeline_mode = #tpu.pipeline_mode<synchronous>, transform_indices = @transform_1, window_bounds = array<i64: 128, 128>}, {pipeline_mode = #tpu.pipeline_mode<synchronous>, transform_indices = @transform_2, window_bounds = array<i64: 1, 128>}, {transform_indices = @transform_3, window_bounds = array<i64: 128, 256>}, {transform_indices = @transform_4, window_bounds = array<i64: 1, 256>}, {transform_indices = @transform_5, window_bounds = array<i64: 128, 512>}]} {
    %c0_i32 = arith.constant 0 : i32
    %0 = arith.cmpi eq, %arg1, %c0_i32 : i32
    %1 = arith.extui %0 : i1 to i32
    %c0_i32_0 = arith.constant 0 : i32
    %2 = arith.cmpi ne, %1, %c0_i32_0 : i32
    scf.if %2 {
      %c0_20 = arith.constant 0 : index
      %c0_21 = arith.constant 0 : index
      %41 = vector.load %arg2[%c0_20, %c0_21] : memref<128x128xbf16, #tpu.memory_space<vmem>>, vector<128x128xbf16>
      %c0_22 = arith.constant 0 : index
      %c0_23 = arith.constant 0 : index
      %42 = vector.load %arg3[%c0_22, %c0_23] : memref<128x128xbf16, #tpu.memory_space<vmem>>, vector<128x128xbf16>
      %cst_24 = arith.constant dense<0.000000e+00> : vector<128x128xf32>
      %43 = tpu.matmul %41, %42, %cst_24 {dimension_numbers = #tpu.dot_dimension_numbers<[1], [0], [0], [1], [0, 0, 1, 1], [], []>} : vector<128x128xbf16>, vector<128x128xbf16>, vector<128x128xf32> -> vector<128x128xf32>
      %c0_25 = arith.constant 0 : index
      %c0_26 = arith.constant 0 : index
      %44 = vector.load %arg4[%c0_25, %c0_26] : memref<1x128xf32, #tpu.memory_space<vmem>>, vector<1x128xf32>
      %45 = vector.broadcast %44 : vector<1x128xf32> to vector<128x128xf32>
      %46 = arith.addf %43, %45 : vector<128x128xf32>
      %47 = math.tanh %46 : vector<128x128xf32>
      %c0_27 = arith.constant 0 : index
      %c0_28 = arith.constant 0 : index
      %48 = vector.load %arg8[%c0_27, %c0_28] : memref<128x128xf32, #tpu.memory_space<vmem>>, vector<128x128xf32>
      tpu.vector_store %arg8[%c0_27, %c0_28], %47 {strides = array<i32>} : memref<128x128xf32, #tpu.memory_space<vmem>>, vector<128x128xf32>,
      %cst_29 = arith.constant 0xFF800000 : f32
      %49 = vector.broadcast %cst_29 : f32 to vector<128x1xf32>
      %c0_30 = arith.constant 0 : index
      %c0_31 = arith.constant 0 : index
      %50 = vector.load %arg10[%c0_30, %c0_31] : memref<128x1xf32, #tpu.memory_space<vmem>>, vector<128x1xf32>
      tpu.vector_store %arg10[%c0_30, %c0_31], %49 {strides = array<i32>} : memref<128x1xf32, #tpu.memory_space<vmem>>, vector<128x1xf32>,
      %cst_32 = arith.constant 0.000000e+00 : f32
      %51 = vector.broadcast %cst_32 : f32 to vector<128x1xf32>
      %c0_33 = arith.constant 0 : index
      %c0_34 = arith.constant 0 : index
      %52 = vector.load %arg11[%c0_33, %c0_34] : memref<128x1xf32, #tpu.memory_space<vmem>>, vector<128x1xf32>
      tpu.vector_store %arg11[%c0_33, %c0_34], %51 {strides = array<i32>} : memref<128x1xf32, #tpu.memory_space<vmem>>, vector<128x1xf32>,
    } else {
    }
    %c0 = arith.constant 0 : index
    %c0_1 = arith.constant 0 : index
    %3 = vector.load %arg8[%c0, %c0_1] : memref<128x128xf32, #tpu.memory_space<vmem>>, vector<128x128xf32>
    %4 = arith.truncf %3 : vector<128x128xf32> to vector<128x128xbf16>
    %c0_2 = arith.constant 0 : index
    %c0_3 = arith.constant 0 : index
    %5 = vector.load %arg5[%c0_2, %c0_3] : memref<128x256xbf16, #tpu.memory_space<vmem>>, vector<128x256xbf16>
    %cst = arith.constant dense<0.000000e+00> : vector<128x256xf32>
    %6 = tpu.matmul %4, %5, %cst {dimension_numbers = #tpu.dot_dimension_numbers<[1], [0], [0], [1], [0, 0, 1, 1], [], []>} : vector<128x128xbf16>, vector<128x256xbf16>, vector<128x256xf32> -> vector<128x256xf32>
    %c0_4 = arith.constant 0 : index
    %c0_5 = arith.constant 0 : index
    %7 = vector.load %arg6[%c0_4, %c0_5] : memref<1x256xf32, #tpu.memory_space<vmem>>, vector<1x256xf32>
    %8 = vector.broadcast %7 : vector<1x256xf32> to vector<128x256xf32>
    %9 = arith.addf %6, %8 : vector<128x256xf32>
    %10 = arith.index_cast %arg1 : i32 to index
    %c0_6 = arith.constant 0 : index
    %c0_7 = arith.constant 0 : index
    %11 = vector.load %arg9[%10, %c0_6, %c0_7] : memref<2x128x256xf32, #tpu.memory_space<vmem>>, vector<1x128x256xf32>
    %12 = vector.shape_cast %11 : vector<1x128x256xf32> to vector<128x256xf32>
    %13 = vector.shape_cast %9 : vector<128x256xf32> to vector<1x128x256xf32>
    tpu.vector_store %arg9[%10, %c0_6, %c0_7], %13 {strides = array<i32>} : memref<2x128x256xf32, #tpu.memory_space<vmem>>, vector<1x128x256xf32>,
    %14 = tpu.iota {dimensions = array<i32: 1>} : vector<128x256xi32>
    %c256_i32 = arith.constant 256 : i32
    %15 = arith.muli %arg1, %c256_i32 : i32
    %16 = vector.broadcast %15 : i32 to vector<128x256xi32>
    %17 = arith.addi %14, %16 : vector<128x256xi32>
    %c300_i32 = arith.constant 300 : i32
    %18 = vector.broadcast %c300_i32 : i32 to vector<128x256xi32>
    %19 = arith.cmpi slt, %17, %18 : vector<128x256xi32>
    %cst_8 = arith.constant 0xFF800000 : f32
    %20 = vector.broadcast %cst_8 : f32 to vector<128x256xf32>
    %21 = arith.select %19, %9, %20 : vector<128x256xi1>, vector<128x256xf32>
    %c0_9 = arith.constant 0 : index
    %c0_10 = arith.constant 0 : index
    %22 = vector.load %arg10[%c0_9, %c0_10] : memref<128x1xf32, #tpu.memory_space<vmem>>, vector<128x1xf32>
    %cst_11 = arith.constant dense<0xFF800000> : vector<128xf32>
    %23 = vector.multi_reduction <maximumf>, %21, %cst_11 [1] : vector<128x256xf32> to vector<128xf32>
    %24 = vector.shape_cast %23 : vector<128xf32> to vector<128x1xf32>
    %25 = arith.maximumf %22, %24 : vector<128x1xf32>
    %c0_12 = arith.constant 0 : index
    %c0_13 = arith.constant 0 : index
    %26 = vector.load %arg11[%c0_12, %c0_13] : memref<128x1xf32, #tpu.memory_space<vmem>>, vector<128x1xf32>
    %27 = arith.subf %22, %25 : vector<128x1xf32>
    %28 = math.exp %27 : vector<128x1xf32>
    %29 = arith.mulf %26, %28 : vector<128x1xf32>
    %30 = vector.broadcast %25 : vector<128x1xf32> to vector<128x256xf32>
    %31 = arith.subf %21, %30 : vector<128x256xf32>
    %32 = math.exp %31 : vector<128x256xf32>
    %cst_14 = arith.constant dense<0.000000e+00> : vector<128xf32>
    %33 = vector.multi_reduction <add>, %32, %cst_14 [1] : vector<128x256xf32> to vector<128xf32>
    %34 = vector.shape_cast %33 : vector<128xf32> to vector<128x1xf32>
    %35 = arith.addf %29, %34 : vector<128x1xf32>
    %c0_15 = arith.constant 0 : index
    %c0_16 = arith.constant 0 : index
    %36 = vector.load %arg11[%c0_15, %c0_16] : memref<128x1xf32, #tpu.memory_space<vmem>>, vector<128x1xf32>
    tpu.vector_store %arg11[%c0_15, %c0_16], %35 {strides = array<i32>} : memref<128x1xf32, #tpu.memory_space<vmem>>, vector<128x1xf32>,
    %c0_17 = arith.constant 0 : index
    %c0_18 = arith.constant 0 : index
    %37 = vector.load %arg10[%c0_17, %c0_18] : memref<128x1xf32, #tpu.memory_space<vmem>>, vector<128x1xf32>
    tpu.vector_store %arg10[%c0_17, %c0_18], %25 {strides = array<i32>} : memref<128x1xf32, #tpu.memory_space<vmem>>, vector<128x1xf32>,
    %c1_i32 = arith.constant 1 : i32
    %38 = arith.cmpi eq, %arg1, %c1_i32 : i32
    %39 = arith.extui %38 : i1 to i32
    %c0_i32_19 = arith.constant 0 : i32
    %40 = arith.cmpi ne, %39, %c0_i32_19 : i32
    scf.if %40 {
      %c0_20 = arith.constant 0 : index
      %c0_21 = arith.constant 0 : index
      %41 = vector.load %arg10[%c0_20, %c0_21] : memref<128x1xf32, #tpu.memory_space<vmem>>, vector<128x1xf32>
      %c0_22 = arith.constant 0 : index
      %c0_23 = arith.constant 0 : index
      %42 = vector.load %arg11[%c0_22, %c0_23] : memref<128x1xf32, #tpu.memory_space<vmem>>, vector<128x1xf32>
      %43 = math.log %42 : vector<128x1xf32>
      %44 = arith.addf %41, %43 : vector<128x1xf32>
      %c0_24 = arith.constant 0 : index
      %c0_25 = arith.constant 0 : index
      %c0_26 = arith.constant 0 : index
      %45 = vector.load %arg9[%c0_24, %c0_25, %c0_26] : memref<2x128x256xf32, #tpu.memory_space<vmem>>, vector<1x128x256xf32>
      %46 = vector.shape_cast %45 : vector<1x128x256xf32> to vector<128x256xf32>
      %47 = vector.broadcast %44 : vector<128x1xf32> to vector<128x256xf32>
      %48 = arith.subf %46, %47 : vector<128x256xf32>
      %c0_27 = arith.constant 0 : index
      %c0_28 = arith.constant 0 : index
      %49 = vector.load %arg7[%c0_27, %c0_28] : memref<128x512xf32, #tpu.memory_space<vmem>>, vector<128x256xf32>
      tpu.vector_store %arg7[%c0_27, %c0_28], %48 {strides = array<i32>} : memref<128x512xf32, #tpu.memory_space<vmem>>, vector<128x256xf32>,
      %c1 = arith.constant 1 : index
      %c0_29 = arith.constant 0 : index
      %c0_30 = arith.constant 0 : index
      %50 = vector.load %arg9[%c1, %c0_29, %c0_30] : memref<2x128x256xf32, #tpu.memory_space<vmem>>, vector<1x128x256xf32>
      %51 = vector.shape_cast %50 : vector<1x128x256xf32> to vector<128x256xf32>
      %52 = vector.broadcast %44 : vector<128x1xf32> to vector<128x256xf32>
      %53 = arith.subf %51, %52 : vector<128x256xf32>
      %c0_31 = arith.constant 0 : index
      %c256 = arith.constant 256 : index
      %54 = vector.load %arg7[%c0_31, %c256] : memref<128x512xf32, #tpu.memory_space<vmem>>, vector<128x256xf32>
      tpu.vector_store %arg7[%c0_31, %c256], %53 {strides = array<i32>} : memref<128x512xf32, #tpu.memory_space<vmem>>, vector<128x256xf32>,
    } else {
    }
    return
  }
  func.func @transform_0(%arg0: i32, %arg1: i32) -> (i32, i32) {
    %c0_i32 = arith.constant 0 : i32
    %c0_i32_0 = arith.constant 0 : i32
    return %arg0, %c0_i32 : i32, i32
  }
  func.func @transform_1(%arg0: i32, %arg1: i32) -> (i32, i32) {
    %c0_i32 = arith.constant 0 : i32
    %c0_i32_0 = arith.constant 0 : i32
    %c0_i32_1 = arith.constant 0 : i32
    return %c0_i32, %c0_i32_0 : i32, i32
  }
  func.func @transform_2(%arg0: i32, %arg1: i32) -> (i32, i32) {
    %c0_i32 = arith.constant 0 : i32
    %c0_i32_0 = arith.constant 0 : i32
    %c0_i32_1 = arith.constant 0 : i32
    return %c0_i32, %c0_i32_0 : i32, i32
  }
  func.func @transform_3(%arg0: i32, %arg1: i32) -> (i32, i32) {
    %c0_i32 = arith.constant 0 : i32
    %c0_i32_0 = arith.constant 0 : i32
    return %c0_i32, %arg1 : i32, i32
  }
  func.func @transform_4(%arg0: i32, %arg1: i32) -> (i32, i32) {
    %c0_i32 = arith.constant 0 : i32
    %c0_i32_0 = arith.constant 0 : i32
    return %c0_i32, %arg1 : i32, i32
  }
  func.func @transform_5(%arg0: i32, %arg1: i32) -> (i32, i32) {
    %c0_i32 = arith.constant 0 : i32
    %c0_i32_0 = arith.constant 0 : i32
    return %arg0, %c0_i32 : i32, i32
  }
}

</mosaic_0001>

<bundles_post_ra>
// kernel: tpu_custom_call.1
= control target key start
LH: loop header
LB: loop body
LE: loop exit
PB: predicated region body
PF: predicated region fallthrough
CT: control target
= control target key end

     0   :  { %s3623_s0 = inlined_call_operand.hbm [shape: bf16[256,128], index: 0, kind: input, shape index: {}]   ;;  %s3624_s1 = inlined_call_operand.hbm [shape: bf16[128,128], index: 1, kind: input, shape index: {}]   ;;  %s3625_s2 = inlined_call_operand.vmem [shape: f32[1,128], index: 2, kind: input, shape index: {}]   ;;  %s3626_s3 = inlined_call_operand.hbm [shape: bf16[128,512], index: 3, kind: input, shape index: {}]   ;;  %s3627_s4 = inlined_call_operand.vmem [shape: f32[1,512], index: 4, kind: input, shape index: {}]   ;;  %s3628_s5 = inlined_call_operand.hbm [shape: f32[256,512], index: 5, kind: output, shape index: {}]  }
   0x1   :  { %3663 = sst [smem:[#allocation42_spill]] %s3623_s0 }
   0x2   :  { %10 = vsyncpa [#allocation7], 0 }
   0x3   :  { %12 = vsyncpa [#allocation7 + $0x1], 0 }
   0x4   :  { %13 = vsyncpa [#allocation10], 0 }
   0x5   :  { %14 = vsyncpa [#allocation8], 0 }
   0x6   :  { %16 = vsyncpa [#allocation8 + $0x1], 0  ;;  %s2626_s18 = smov 0   ;;  %s2628_s19 = smov 0  }
   0x7   :  { %s2630_s20 = smov 0   ;;  %s2632_s21 = smov 0  }
   0x8   :  { %s2634_s22 = smov 0   ;;  %s2636_s23 = smov 0  }
   0x9   :  { %s2638_s24 = smov 0   ;;  %s2640_s25 = smov 0  }
   0xa   :  { %s2642_s26 = smov 0   ;;  %s2644_s27 = smov 0  }
   0xb   :  { %s2646_s28 = smov 0  }
   0xc LB: > { %3664 = sst [smem:[#allocation17_spill]] %s2547_s20  ;;  %s31_s29 = sadd.s32 1, %s2571_s26  ;;  %s2579_s28 = sphi %s2646_s28, %s22_s28   ;;  %s2575_s27 = sphi %s2644_s27, %s3753_s27   ;;  %s2571_s26 = sphi %s2642_s26, %s3752_s26   ;;  %s2567_s25 = sphi %s2640_s25, %s3751_s25   ;;  %s2563_s24 = sphi %s2638_s24, %s3750_s24   ;;  %s2559_s23 = sphi %s2636_s23, %s3749_s23   ;;  %s2555_s22 = sphi %s2634_s22, %s3757_s22   ;;  %s2551_s21 = sphi %s2632_s21, %s3756_s21   ;;  %s2547_s20 = sphi %s2630_s20, %s3747_s20   ;;  %s2543_s19 = sphi %s2628_s19, %s3755_s19   ;;  %s2539_s18 = sphi %s2626_s18, %s3754_s18  }
   0xd   : > { %3665 = sst [smem:[#allocation18_spill]] %s2551_s21  ;;  %s34_s30 = sadd.s32 1, %s2575_s27 }
   0xe   : > { %3666 = sst [smem:[#allocation19_spill]] %s2559_s23  ;;  %p32_p0 = scmp.ge.s32.totalorder %s31_s29, 2 }
   0xf   : > { %3667 = sst [smem:[#allocation20_spill]] %s2571_s26  ;;  %s41_s6 = sadd.s32 1, %s2559_s23 }
  0x10   : > { %3668 = sst [smem:[#allocation21_spill]] %s2575_s27  ;;  %p3633_p1 = scmp.ne.s32.totalorder %s2559_s23, %s2555_s22 }
  0x11   : > { %p3634_p2 = scmp.eq.s32.totalorder %s2579_s28, 0  ;;  %s3759_s29 = smov (%p32_p0, %s31_s29), 0 }
  0x12   : > { %3669 = sst [smem:[#allocation22_spill]] %s3759_s29  ;;  %s3761_s30 = smov (!%p32_p0, %s34_s30), %s2575_s27 }
  0x13   : > { %p2695_p3 = por %p3634_p2, %p3633_p1  ;;  %s106_s8 = ssub.s32 %s2571_s26, %s3759_s29 }
  0x14   : > { %p36_p4 = scmp.ge.s32.totalorder %s3761_s30, 2  ;;  %p2701_p5 = scmp.eq.s32.totalorder %s106_s8, 0 }
  0x15   : > { %p3632_p6 = scmp.lt.s32.totalorder %s2579_s28, 4  ;;  %s214_s11 = sand.u32 1, %s2579_s28  }
  0x16   : > { %s3763_s30 = smov (%p36_p4, %s3761_s30), 0  ;;  %s216_s12 = sand.u32 1, %s2559_s23  }
  0x17   : > { %3672 = sst [smem:[#allocation23_spill]] %s3763_s30  ;;  %s38_s10 = ssub.s32 %s2575_s27, %s3763_s30 }
  0x18   : > { %p39_p7 = scmp.eq.s32.totalorder %s38_s10, 0  ;;  %s1943_s13 = sshll.u32 %s2575_s27, 10 }
  0x19   : > { %s1887_s15 = sshll.u32 %s216_s12, 6  ;;  %s3674_s0 = sld [smem:[#allocation42_spill]] }
  0x1a   : > { %s2714_s14 = scalar_select %p39_p7, %s2559_s23, %s41_s6  }
  0x1b   : > { %p2725_p8 = pnand %p3632_p6, %p2695_p3  ;;  %s218_s6 = scalar_lea.vmem [#allocation6], %s1887_s15 }
  0x1c   : > { %3673 = sst [smem:[#allocation24_spill]] %s2714_s14  ;;  %s225_s10 = sshll.u32 %s218_s6, 4  ;;  %s2729_s10 = int_to_ptr.vmem [resolvable:$true] %s225_s10 }
  0x1d   : > { %s2731_s12 = scalar_lea.sflag [#allocation7], %s214_s11  ;;  %p2363_p10 = pneg %p2725_p8 }
  0x1f   : > { %s2719_s29 = scalar_lea.hbm %s3674_s0, %s1943_s13  ;;  %s2366_s17 = scalar_lea.hbm %s3674_s0, 2048 }
  0x20   : > { %s2361_s13 = scalar_lea.hbm %s2719_s29, 1024  ;;  %p2367_p13 = scmp.lt.u32.totalorder %s2719_s29, %s3674_s0 }
  0x21   : > { %p2362_p9 = scmp.ne.s32.totalorder %s2719_s29, %s2361_s13  ;;  %p2368_p0 = scmp.lt.u32.totalorder %s2366_s17, %s2361_s13 }
  0x22   : > { %p2370_p4 = scmp.lt.u32.totalorder %s2361_s13, %s2719_s29 }
  0x23   : > { %p2364_p11 = pnand %p2363_p10, %p2362_p9  ;;  %p2369_p3 = por %p2368_p0, %p2367_p13 }
  0x25   : > { %p2365_p12 = pneg %p2364_p11  ;;  %p2371_p7 = por %p2370_p4, %p2369_p3 }
  0x27   : > { %p2372_p6 = pnand %p2371_p7, %p2365_p12 }
  0x29   : > { %2375 = shalt.err (!%p2372_p6)
}
  0x2a   : > { %s2376_s11 = scalar_lea.vmem %s2729_s10, 1024  ;;  %s2581_s15 = smov [#allocation6]  }
  0x2b   : > { %p2377_p9 = scmp.ne.s32.totalorder %s2729_s10, %s2376_s11  ;;  %s2381_s6 = sshll.u32 %s2581_s15, 4  ;;  %s2382_s6 = int_to_ptr.vmem [resolvable:$false] %s2381_s6 }
  0x2c   : > { %s2383_s27 = scalar_lea.vmem %s2382_s6, 2048  ;;  %p2384_p2 = scmp.lt.s32.totalorder %s2729_s10, %s2382_s6 }
  0x2d   : > { %p2379_p11 = pnand %p2377_p9, %p2363_p10  ;;  %p2385_p13 = scmp.lt.s32.totalorder %s2383_s27, %s2376_s11 }
  0x2f   : > { %p2380_p1 = pneg %p2379_p11  ;;  %p2386_p0 = por %p2385_p13, %p2384_p2 }
  0x31   : > { %p2387_p3 = pnand %p2386_p0, %p2380_p1 }
  0x33   : > { %2390 = shalt.err (!%p2387_p3)
}
  0x34   : > { %s3636_s30 = smov 64   ;;  %s3637_s13 = smov 4  }
  0x35   : > { %2045 = dma.hbm_to_vmem [thread:$0]  (!%p2725_p8), %s2719_s29, 1024, %s2729_s10, %s2731_s12, %s3636_s30, %s3636_s30, %s3637_s13  }
  0x36   : > { %s2763_s7 = sadd.s32 4294967295, %s2579_s28   ;;  %s1883_s16 = sadd.s32 4294967294, %s2579_s28  }
  0x37   : > { %p54_p1 = scmp.ne.s32.totalorder %s2555_s22, %s2551_s21  ;;  %p3643_p2 = scmp.eq.s32.totalorder %s2763_s7, 0 }
  0x38   : > { %s109_s17 = sadd.s32 1, %s2547_s20  ;;  %p116_p8 = scmp.ne.s32.totalorder %s2547_s20, %s2543_s19 }
  0x39   : > { %s2773_s11 = scalar_select %p2701_p5, %s2547_s20, %s109_s17  }
  0x3a   : > { %p2777_p6 = por %p3643_p2, %p54_p1  ;;  %p122_p10 = scmp.ne.s32.totalorder %s2543_s19, %s2539_s18 }
  0x3b   : > { %3676 = sst [smem:[#allocation25_spill]] %s2773_s11  ;;  %p172_p12 = scmp.eq.s32.totalorder %s2763_s7, 3 }
  0x3c   : > { %s3677_s8 = scalar_select %p2777_p6, 1, 0 }
  0x3d   : > { %p3678_p4 = scmp.eq.s32.totalorder %s2579_s28, 0  ;;  %p178_p9 = scmp.eq.s32.totalorder %s1883_s16, 3 }
  0x3e   : > { %p2790_p11 = por %p122_p10, %p3643_p2  ;;  %p3680_p5 = scmp.ne.s32.totalorder %s2559_s23, %s2555_s22 }
  0x3f   : > { %p118_p7 = por %p116_p8, %p3678_p4  ;;  %p2801_p0 = por %p178_p9, %p54_p1 }
  0x40   : > { %s3679_s29 = scalar_select %p2790_p11, 1, 0 }
  0x41   : > { %p2797_p13 = por %p172_p12, %p3680_p5  ;;  %p1884_p3 = scmp.ge.s32.totalorder %s2579_s28, 1 }
  0x42   : > { %s3682_s10 = scalar_select %p2801_p0, 1, 0 }
  0x43   : > { %s3681_s9 = scalar_select %p2797_p13, 1, 0 }
  0x44   : > { %3683 = sst [smem:[#allocation26_spill]] %s3682_s10  ;;  %p185_p6 = scmp.lt.s32.totalorder %s2579_s28, 5 }
  0x45   : > { %p3684_p4 = scmp.lt.s32.totalorder %s2579_s28, 4  ;;  %s2584_s6 = smov [#allocation9]  }
  0x46   : > { %p2813_p10 = pnand %p1884_p3, %p185_p6  ;;  %s197_s27 = sshll.u32 %s2584_s6, 4  ;;  %s2817_s27 = int_to_ptr.vmem [resolvable:$true] %s197_s27 }
  0x47   : > { %p2809_p8 = pnand %p3684_p4, %p118_p7  ;;  %s237_s16 = sand.u32 1, %s2547_s20  }
  0x48   : > { %s3686_s15 = scalar_select %p2813_p10, 1, 0 }
  0x49   : > { %s3685_s18 = scalar_select %p2809_p8, 1, 0 }
  0x4a   : > { %p2038_p1 = pneg %p2813_p10  ;;  %s1890_s17 = sshll.u32 %s237_s16, 7 }
  0x4b   : > { %s1944_s30 = sshll.u32 %s2571_s26, 7  ;;  %s239_s11 = scalar_lea.vmem [#allocation11], %s1890_s17 }
  0x4c   : > { %p2825_p12 = pnand %p2038_p1, %p3643_p2  ;;  %s2832_s23 = scalar_lea.hbm %s3626_s3, %s1944_s30 }
  0x4d   : > { %s246_s6 = sshll.u32 %s239_s11, 4  ;;  %s2391_s16 = scalar_lea.hbm %s3624_s1, 1024  ;;  %s2834_s6 = int_to_ptr.vmem [resolvable:$true] %s246_s6 }
  0x4e   : > { %p2392_p6 = scmp.ne.s32.totalorder %s3624_s1, %s2391_s16  ;;  %p2393_p7 = pneg %p2825_p12 }
  0x4f   : > { %p2398_p3 = scmp.lt.u32.totalorder %s2391_s16, %s3624_s1 }
  0x50   : > { %p2394_p9 = pnand %p2393_p7, %p2392_p6 }
  0x52   : > { %p2395_p5 = pneg %p2394_p9 }
  0x54   : > { %p2400_p4 = pnand %p2398_p3, %p2395_p5 }
  0x56   : > { %2403 = shalt.err (!%p2400_p4)
}
  0x57   : > { %s2404_s30 = scalar_lea.vmem %s2817_s27, 1024  ;;  %p2412_p13 = scmp.lt.s32.totalorder %s2817_s27, %s2817_s27 }
  0x58   : > { %p2405_p1 = scmp.ne.s32.totalorder %s2817_s27, %s2404_s30  ;;  %p2413_p11 = scmp.lt.s32.totalorder %s2404_s30, %s2404_s30 }
  0x5a   : > { %p2407_p2 = pnand %p2405_p1, %p2393_p7  ;;  %p2414_p10 = por %p2413_p11, %p2412_p13 }
  0x5c   : > { %p2408_p0 = pneg %p2407_p2 }
  0x5e   : > { %p2415_p8 = pnand %p2414_p10, %p2408_p0 }
  0x60   : > { %2418 = shalt.err (!%p2415_p8)
}
  0x61   : > { %s3688_s20 = smov 4   ;;  %s3689_s21 = smov 64  }
  0x62   : > { %2041 = dma.hbm_to_vmem [thread:$0]  (!%p2825_p12), %s3624_s1, 1024, %s2817_s27, [#allocation10], %s3689_s21, %s3689_s21, %s3688_s20  }
  0x63   : > { %s2419_s10 = scalar_lea.hbm %s2832_s23, 2048  ;;  %p3690_p11 = scmp.ne.s32.totalorder %s3685_s18, 0 }
  0x64   : > { %p2420_p2 = scmp.ne.s32.totalorder %s2832_s23, %s2419_s10  ;;  %s2424_s16 = scalar_lea.hbm %s3626_s3, 4096 }
  0x65   : > { %p2421_p13 = pneg %p3690_p11  ;;  %p2425_p10 = scmp.lt.u32.totalorder %s2832_s23, %s3626_s3 }
  0x66   : > { %p2426_p6 = scmp.lt.u32.totalorder %s2424_s16, %s2419_s10  ;;  %p2428_p9 = scmp.lt.u32.totalorder %s2419_s10, %s2832_s23 }
  0x67   : > { %p2422_p0 = pnand %p2421_p13, %p2420_p2 }
  0x68   : > { %p2427_p7 = por %p2426_p6, %p2425_p10 }
  0x69   : > { %p2423_p8 = pneg %p2422_p0 }
  0x6a   : > { %p2429_p12 = por %p2428_p9, %p2427_p7 }
  0x6c   : > { %p2430_p5 = pnand %p2429_p12, %p2423_p8 }
  0x6e   : > { %2433 = shalt.err (!%p2430_p5)
}
  0x6f   : > { %s2434_s27 = scalar_lea.vmem %s2834_s6, 2048  ;;  %s2585_s30 = smov [#allocation11]  }
  0x70   : > { %p2435_p3 = scmp.ne.s32.totalorder %s2834_s6, %s2434_s27  ;;  %s2439_s20 = sshll.u32 %s2585_s30, 4  ;;  %s2440_s20 = int_to_ptr.vmem [resolvable:$false] %s2439_s20 }
  0x71   : > { %s2441_s21 = scalar_lea.vmem %s2440_s20, 4096  ;;  %p2442_p2 = scmp.lt.s32.totalorder %s2834_s6, %s2440_s20 }
  0x72   : > { %p2437_p4 = pnand %p2435_p3, %p2421_p13  ;;  %p2443_p0 = scmp.lt.s32.totalorder %s2441_s21, %s2434_s27 }
  0x74   : > { %p2438_p1 = pneg %p2437_p4  ;;  %p2444_p10 = por %p2443_p0, %p2442_p2 }
  0x76   : > { %p2445_p6 = pnand %p2444_p10, %p2438_p1 }
  0x78   : > { %2448 = shalt.err (!%p2445_p6)
}
  0x79   : > { %s2586_s26 = smov 256   ;;  %s2587_s11 = smov 128  }
  0x7a   : > { %s2588_s10 = smov 8   ;;  %p3691_p13 = scmp.ne.s32.totalorder %s3686_s15, 0 }
  0x7b   : > { %2048 = dma.hbm_to_vmem [thread:$0]  (!%p3690_p11), %s2832_s23, 2048, %s2834_s6, %s2731_s12, %s2586_s26, %s2587_s11, %s2588_s10  }
  0x7c   : > { %266 = sbr.rel (%p3691_p13) target bundleno = 1345 (0x541), region = 40 }
  0x83   : > { %s268_s13 = sand.u32 1, %s2763_s7   ;;  %s2890_s17 = sand.u32 1, %s2555_s22  }
  0x84   : > { %s1894_s16 = sshll.u32 %s2890_s17, 6  ;;  %s269_s0 = scalar_lea.sflag [#allocation7], %s268_s13 }
  0x85   : > { %s2893_s14 = scalar_lea.vmem [#allocation6], %s1894_s16  ;;  %p3692_p8 = scmp.ne.s32.totalorder %s3677_s8, 0 }
  0x87   : > { %2522 = dma.done.wait (%p3692_p8), %s269_s0, 1024  }
  0x88   : > { %2524 = vsyncadd (%p3692_p8), %s269_s0, 4294966272  ;;  %p3693_p11 = scmp.eq.s32.totalorder %s2763_s7, 0 }
  0x8a   : > { %2526 = dma.done.wait (%p3693_p11), [#allocation10], 1024   ;;  %p3694_p7 = pmov %p3693_p11 }
  0x8b   : > { %s283_s23 = sand.u32 1, %s2543_s19   ;;  %p3695_p9 = scmp.ne.s32.totalorder %s3679_s29, 0 }
  0x8c   : > { %2528 = vsyncadd (%p3694_p7), [#allocation10], 4294966272  ;;  %s1896_s12 = sshll.u32 %s283_s23, 7 }
  0x8d   : > { %s2904_s18 = scalar_lea.vmem [#allocation11], %s1896_s12 }
  0x8e   : > { %2530 = dma.done.wait (%p3695_p9), %s269_s0, 2048  }
  0x8f   : > { %2532 = vsyncadd (%p3695_p9), %s269_s0, 4294965248  ;;  %s1897_s8 = sshll.u32 %s2890_s17, 9  ;;  %s1898_s15 = sshll.u32 %s2563_s24, 1 }
  0x90   : > { %p324_p12 = scmp.lt.s32.totalorder %s1898_s15, 3  ;;  %s2918_s30 = scalar_lea.vmem [#allocation12], %s1897_s8 }
  0x91   : > { %p1899_p5 = scmp.ne.s32.totalorder %s2563_s24, 0 }
  0x92   : > { %s3765_s15 = smov (!%p324_p12, %s1898_s15), 3  ;;  %v2157_v0 = vld [vmem:[#allocation9] sm:$0xff] (!%p1899_p5)   ;;  %v2158_v1 = vld [vmem:[#allocation9 + $0x8] sm:$0xff] (!%p1899_p5)   ;;  %v2159_v2 = vld [vmem:[#allocation9 + $0x10] sm:$0xff] (!%p1899_p5)   ;;  %vm598_vm0 = vcmask (!%p1899_p5), 7168   ;;  %v2589_v16 = vmov (!%p1899_p5), -inf  }
  0x93   : > { %s326_s27 = scalar_lea.vmem %s3627_s4, %s3765_s15  ;;  %333 = sbr.rel (%p1899_p5) target bundleno = 420 (0x1a4), region = 56  ;;  %1964 = vmatprep.subr.bf16.mxu0 (!%p1899_p5), %v2157_v0  ;;  %1996 = vmatprep.subr.bf16.mxu1 (!%p1899_p5), %v2157_v0  ;;  %v2160_v3 = vld [vmem:[#allocation9 + $0x18] sm:$0xff] (!%p1899_p5)   ;;  %v2165_v4 = vld [vmem:[%s2893_s14] sm:$0xff] (!%p1899_p5)   ;;  %v2162_v7 = vld [vmem:[#allocation9 + $0x28] sm:$0xff] (!%p1899_p5)   ;;  %599 = vst.msk [vmem:[#allocation4] sm:$0xff] (!%p1899_p5), %vm598_vm0, %v2589_v16  ;;  %v2590_v17 = vmov (!%p1899_p5), 0.0  }
  0x94   : > { %1965 = vmatpush3.bf16.msra.mxu0 (!%p1899_p5), %v2157_v0  ;;  %2004 = vmatpush3.bf16.msra.mxu1 (!%p1899_p5), %v2157_v0  ;;  %v2166_v5 = vld [vmem:[%s2893_s14 + $0x20] sm:$0xff] (!%p1899_p5)   ;;  %v2163_v8 = vld [vmem:[#allocation9 + $0x30] sm:$0xff] (!%p1899_p5)   ;;  %v2164_v9 = vld [vmem:[#allocation9 + $0x38] sm:$0xff] (!%p1899_p5)   ;;  %600 = vst.msk [vmem:[#allocation4 + $0x8] sm:$0xff] (!%p1899_p5), %vm598_vm0, %v2589_v16 }
  0x95   : > { %1966 = vmatprep.subr.bf16.mxu0 (!%p1899_p5), %v2158_v1  ;;  %1997 = vmatprep.subr.bf16.mxu1 (!%p1899_p5), %v2158_v1  ;;  %v2161_v6 = vld [vmem:[#allocation9 + $0x20] sm:$0xff] (!%p1899_p5)   ;;  %v2167_v10 = vld [vmem:[%s2893_s14 + $0x8] sm:$0xff] (!%p1899_p5)   ;;  %v2169_v12 = vld [vmem:[%s2893_s14 + $0x10] sm:$0xff] (!%p1899_p5)   ;;  %601 = vst.msk [vmem:[#allocation4 + $0x10] sm:$0xff] (!%p1899_p5), %vm598_vm0, %v2589_v16 }
  0x96   : > { %1980 = vmatprep.mubr.bf16.mxu0 (!%p1899_p5), %v2165_v4  ;;  %1988 = vmatprep.mubr.bf16.mxu1 (!%p1899_p5), %v2166_v5  ;;  %v2168_v11 = vld [vmem:[%s2893_s14 + $0x28] sm:$0xff] (!%p1899_p5)   ;;  %v2170_v13 = vld [vmem:[%s2893_s14 + $0x30] sm:$0xff] (!%p1899_p5)   ;;  %v2171_v14 = vld [vmem:[%s2893_s14 + $0x18] sm:$0xff] (!%p1899_p5)   ;;  %602 = vst.msk [vmem:[#allocation4 + $0x18] sm:$0xff] (!%p1899_p5), %vm598_vm0, %v2589_v16 }
  0x97   : > { %v2172_v15 = vld [vmem:[%s2893_s14 + $0x38] sm:$0xff] (!%p1899_p5)   ;;  %603 = vst.msk [vmem:[#allocation4 + $0x20] sm:$0xff] (!%p1899_p5), %vm598_vm0, %v2589_v16  ;;  %604 = vst.msk [vmem:[#allocation4 + $0x28] sm:$0xff] (!%p1899_p5), %vm598_vm0, %v2589_v16  ;;  %v1900_v18 = vld [vmem:[%s3625_s2] ss:$0 sm:$0xff] (!%p1899_p5) }
  0x98   : > { %1967 = vmatpush3.bf16.msra.mxu0 (!%p1899_p5), %v2158_v1  ;;  %2005 = vmatpush3.bf16.msra.mxu1 (!%p1899_p5), %v2158_v1  ;;  %605 = vst.msk [vmem:[#allocation4 + $0x30] sm:$0xff] (!%p1899_p5), %vm598_vm0, %v2589_v16  ;;  %606 = vst.msk [vmem:[#allocation4 + $0x38] sm:$0xff] (!%p1899_p5), %vm598_vm0, %v2589_v16 }
  0x99   : > { %1968 = vmatprep.subr.bf16.mxu0 (!%p1899_p5), %v2159_v2  ;;  %1998 = vmatprep.subr.bf16.mxu1 (!%p1899_p5), %v2159_v2  ;;  %607 = vst.msk [vmem:[#allocation4 + $0x40] sm:$0xff] (!%p1899_p5), %vm598_vm0, %v2589_v16  ;;  %608 = vst.msk [vmem:[#allocation4 + $0x48] sm:$0xff] (!%p1899_p5), %vm598_vm0, %v2589_v16 }
  0x9a   : > { %609 = vst.msk [vmem:[#allocation4 + $0x50] sm:$0xff] %vm598_vm0, %v2589_v16  ;;  %610 = vst.msk [vmem:[#allocation4 + $0x58] sm:$0xff] %vm598_vm0, %v2589_v16 }
  0x9b   : > { %611 = vst.msk [vmem:[#allocation4 + $0x60] sm:$0xff] %vm598_vm0, %v2589_v16  ;;  %612 = vst.msk [vmem:[#allocation4 + $0x68] sm:$0xff] %vm598_vm0, %v2589_v16 }
  0x9c   : > { %1969 = vmatpush3.bf16.msra.mxu0 %v2159_v2  ;;  %2006 = vmatpush3.bf16.msra.mxu1 %v2159_v2  ;;  %613 = vst.msk [vmem:[#allocation4 + $0x70] sm:$0xff] %vm598_vm0, %v2589_v16  ;;  %614 = vst.msk [vmem:[#allocation4 + $0x78] sm:$0xff] %vm598_vm0, %v2589_v16 }
  0x9d   : > { %1970 = vmatprep.subr.bf16.mxu0 %v2160_v3  ;;  %1999 = vmatprep.subr.bf16.mxu1 %v2160_v3  ;;  %615 = vst.msk [vmem:[#allocation5] sm:$0xff] %vm598_vm0, %v2590_v17  ;;  %616 = vst.msk [vmem:[#allocation5 + $0x8] sm:$0xff] %vm598_vm0, %v2590_v17 }
  0x9e   : > { %617 = vst.msk [vmem:[#allocation5 + $0x10] sm:$0xff] %vm598_vm0, %v2590_v17  ;;  %618 = vst.msk [vmem:[#allocation5 + $0x18] sm:$0xff] %vm598_vm0, %v2590_v17 }
  0x9f   : > { %619 = vst.msk [vmem:[#allocation5 + $0x20] sm:$0xff] %vm598_vm0, %v2590_v17  ;;  %620 = vst.msk [vmem:[#allocation5 + $0x28] sm:$0xff] %vm598_vm0, %v2590_v17 }
  0xa0   : > { %1971 = vmatpush3.bf16.msra.mxu0 %v2160_v3  ;;  %2007 = vmatpush3.bf16.msra.mxu1 %v2160_v3  ;;  %621 = vst.msk [vmem:[#allocation5 + $0x30] sm:$0xff] %vm598_vm0, %v2590_v17  ;;  %622 = vst.msk [vmem:[#allocation5 + $0x38] sm:$0xff] %vm598_vm0, %v2590_v17 }
  0xa1   : > { %1972 = vmatprep.subr.bf16.mxu0 %v2161_v6  ;;  %2000 = vmatprep.subr.bf16.mxu1 %v2161_v6  ;;  %623 = vst.msk [vmem:[#allocation5 + $0x40] sm:$0xff] %vm598_vm0, %v2590_v17  ;;  %624 = vst.msk [vmem:[#allocation5 + $0x48] sm:$0xff] %vm598_vm0, %v2590_v17 }
  0xa2   : > { %625 = vst.msk [vmem:[#allocation5 + $0x50] sm:$0xff] %vm598_vm0, %v2590_v17  ;;  %626 = vst.msk [vmem:[#allocation5 + $0x58] sm:$0xff] %vm598_vm0, %v2590_v17 }
  0xa3   : > { %627 = vst.msk [vmem:[#allocation5 + $0x60] sm:$0xff] %vm598_vm0, %v2590_v17  ;;  %628 = vst.msk [vmem:[#allocation5 + $0x68] sm:$0xff] %vm598_vm0, %v2590_v17 }
  0xa4   : > { %1973 = vmatpush3.bf16.msra.mxu0 %v2161_v6  ;;  %2008 = vmatpush3.bf16.msra.mxu1 %v2161_v6  ;;  %629 = vst.msk [vmem:[#allocation5 + $0x70] sm:$0xff] %vm598_vm0, %v2590_v17  ;;  %630 = vst.msk [vmem:[#allocation5 + $0x78] sm:$0xff] %vm598_vm0, %v2590_v17 }
  0xa5   : > { %1974 = vmatprep.subr.bf16.mxu0 %v2162_v7  ;;  %2001 = vmatprep.subr.bf16.mxu1 %v2162_v7 }
  0xa8   : > { %1975 = vmatpush3.bf16.msra.mxu0 %v2162_v7  ;;  %2009 = vmatpush3.bf16.msra.mxu1 %v2162_v7 }
  0xa9   : > { %1976 = vmatprep.subr.bf16.mxu0 %v2163_v8  ;;  %2002 = vmatprep.subr.bf16.mxu1 %v2163_v8 }
  0xac   : > { %1977 = vmatpush3.bf16.msra.mxu0 %v2163_v8  ;;  %2010 = vmatpush3.bf16.msra.mxu1 %v2163_v8 }
  0xad   : > { %1978 = vmatprep.subr.bf16.mxu0 %v2164_v9  ;;  %2003 = vmatprep.subr.bf16.mxu1 %v2164_v9 }
  0xb0   : > { %1979 = vmatpush3.bf16.msra.mxu0 %v2164_v9  ;;  %2011 = vmatpush3.bf16.msra.mxu1 %v2164_v9 }
  0xb3   : > { %1981 = vmatmul.mubr.bf16.vlgmr.msra.gmra.mrb[0].mxu0 %v2167_v10  ;;  %1989 = vmatmul.mubr.bf16.vlgmr.msra.gmra.mrb[0].mxu1 %v2168_v11 }
  0xb4   : > { %1984 = vmatprep.mubr.bf16.mxu0 %v2169_v12  ;;  %1992 = vmatprep.mubr.bf16.mxu1 %v2170_v13 }
  0xbb   : > { %1985 = vmatmul.mubr.bf16.gmra.mrb[4].mxu0 %v2171_v14  ;;  %1993 = vmatmul.mubr.bf16.gmra.mrb[4].mxu1 %v2172_v15 }
 0x186   : > { %v1982_v19 = vpop.f32.mrb[0].mxu0  ;;  %v1990_v20 = vpop.f32.mrb[0].mxu1 }
 0x187   : > { %v512_v21 = vadd.f32 %v1982_v19, %v1900_v18  ;;  %v544_v22 = vadd.f32 %v1990_v20, %v1900_v18  ;;  %v503_v23 = vpop.f32.mrb[1].mxu0  ;;  %v535_v24 = vpop.f32.mrb[1].mxu1 }
 0x188   : > { %v504_v25 = vadd.f32 %v1900_v18, %v503_v23  ;;  %v536_v26 = vadd.f32 %v1900_v18, %v535_v24  ;;  %v1983_v27 = vpop.f32.mrb[2].mxu0  ;;  %v1991_v28 = vpop.f32.mrb[2].mxu1 }
 0x189   : > { %2173 = vtanh.f32 %v512_v21  ;;  %v515_v29 = vadd.f32 %v1983_v27, %v1900_v18  ;;  %v506_v30 = vpop.f32.mrb[3].mxu0  ;;  %v538_v31 = vpop.f32.mrb[3].mxu1  ;;  %v547_v32 = vadd.f32 %v1991_v28, %v1900_v18 }
 0x18a   : > { %2175 = vtanh.f32 %v544_v22  ;;  %v507_v33 = vadd.f32 %v1900_v18, %v506_v30  ;;  %v539_v34 = vadd.f32 %v1900_v18, %v538_v31 }
 0x18b   : > { %2177 = vtanh.f32 %v504_v25 }
 0x18c   : > { %2179 = vtanh.f32 %v536_v26 }
 0x18d   : > { %2181 = vtanh.f32 %v515_v29 }
 0x18e   : > { %2183 = vtanh.f32 %v547_v32  ;;  %v1986_v35 = vpop.f32.mrb[4].mxu0  ;;  %v1994_v36 = vpop.f32.mrb[4].mxu1 }
 0x18f   : > { %2185 = vtanh.f32 %v507_v33  ;;  %v528_v37 = vadd.f32 %v1986_v35, %v1900_v18  ;;  %v560_v38 = vadd.f32 %v1994_v36, %v1900_v18  ;;  %v519_v39 = vpop.f32.mrb[5].mxu0  ;;  %v551_v40 = vpop.f32.mrb[5].mxu1 }
 0x190   : > { %2187 = vtanh.f32 %v539_v34  ;;  %v520_v41 = vadd.f32 %v1900_v18, %v519_v39  ;;  %v552_v42 = vadd.f32 %v1900_v18, %v551_v40  ;;  %v1987_v43 = vpop.f32.mrb[6].mxu0  ;;  %v1995_v44 = vpop.f32.mrb[6].mxu1 }
 0x191   : > { %2189 = vtanh.f32 %v528_v37  ;;  %v531_v45 = vadd.f32 %v1987_v43, %v1900_v18  ;;  %v522_v46 = vpop.f32.mrb[7].mxu0  ;;  %v554_v47 = vpop.f32.mrb[7].mxu1  ;;  %v563_v48 = vadd.f32 %v1995_v44, %v1900_v18 }
 0x192   : > { %2191 = vtanh.f32 %v560_v38  ;;  %v523_v50 = vadd.f32 %v1900_v18, %v522_v46  ;;  %v555_v52 = vadd.f32 %v1900_v18, %v554_v47 }
 0x193   : > { %v2174_v49 = vpop.eup %2173  ;;  %2193 = vtanh.f32 %v520_v41 }
 0x194   : > { %v2176_v51 = vpop.eup %2175  ;;  %584 = vst [vmem:[#allocation2 + $0x10] sm:$0xff] %v2174_v49  ;;  %2195 = vtanh.f32 %v552_v42 }
 0x195   : > { %v2178_v53 = vpop.eup %2177  ;;  %592 = vst [vmem:[#allocation2 + $0x50] sm:$0xff] %v2176_v51  ;;  %2197 = vtanh.f32 %v531_v45 }
 0x196   : > { %v2180_v54 = vpop.eup %2179  ;;  %582 = vst [vmem:[#allocation2] sm:$0xff] %v2178_v53  ;;  %2199 = vtanh.f32 %v563_v48 }
 0x197   : > { %v2182_v55 = vpop.eup %2181  ;;  %590 = vst [vmem:[#allocation2 + $0x40] sm:$0xff] %v2180_v54  ;;  %2201 = vtanh.f32 %v523_v50 }
 0x198   : > { %v2184_v56 = vpop.eup %2183  ;;  %585 = vst [vmem:[#allocation2 + $0x18] sm:$0xff] %v2182_v55  ;;  %2203 = vtanh.f32 %v555_v52 }
 0x199   : > { %v2186_v57 = vpop.eup %2185  ;;  %593 = vst [vmem:[#allocation2 + $0x58] sm:$0xff] %v2184_v56 }
 0x19a   : > { %v2188_v58 = vpop.eup %2187  ;;  %583 = vst [vmem:[#allocation2 + $0x8] sm:$0xff] %v2186_v57 }
 0x19b   : > { %v2190_v59 = vpop.eup %2189  ;;  %591 = vst [vmem:[#allocation2 + $0x48] sm:$0xff] %v2188_v58 }
 0x19c   : > { %v2192_v60 = vpop.eup %2191  ;;  %588 = vst [vmem:[#allocation2 + $0x30] sm:$0xff] %v2190_v59 }
 0x19d   : > { %v2194_v61 = vpop.eup %2193  ;;  %596 = vst [vmem:[#allocation2 + $0x70] sm:$0xff] %v2192_v60 }
 0x19e   : > { %v2196_v62 = vpop.eup %2195  ;;  %586 = vst [vmem:[#allocation2 + $0x20] sm:$0xff] %v2194_v61 }
 0x19f   : > { %v2198_v63 = vpop.eup %2197  ;;  %594 = vst [vmem:[#allocation2 + $0x60] sm:$0xff] %v2196_v62 }
 0x1a0   : > { %v2200_v0 = vpop.eup %2199  ;;  %589 = vst [vmem:[#allocation2 + $0x38] sm:$0xff] %v2198_v63 }
 0x1a1   : > { %v2202_v1 = vpop.eup %2201  ;;  %597 = vst [vmem:[#allocation2 + $0x78] sm:$0xff] %v2200_v0 }
 0x1a2   : > { %v2204_v2 = vpop.eup %2203  ;;  %587 = vst [vmem:[#allocation2 + $0x28] sm:$0xff] %v2202_v1 }
 0x1a3   : > { %595 = vst [vmem:[#allocation2 + $0x68] sm:$0xff] %v2204_v2 }
 0x1a4 PF: > { %v2207_v3 = vld [vmem:[%s2904_s18 + $0x4] ss:$8 sps:$4 sm:$0xff]   ;;  %v2209_v4 = vld [vmem:[%s2904_s18] ss:$8 sps:$4 sm:$0xff]   ;;  %v2591_v5 = vmov 0   ;;  %v633_v26 = vld [vmem:[#allocation2 + $0x10] sm:$0xff]  ;;  %v673_v44 = vlaneseq }
 0x1a5   : > { %795 = vmatprep.mubr.bf16.mxu0 %v2591_v5  ;;  %835 = vmatprep.mubr.bf16.mxu1 %v2591_v5  ;;  %v2210_v6 = vld [vmem:[%s2904_s18 + $0x14] ss:$8 sps:$4 sm:$0xff]   ;;  %v2212_v7 = vld [vmem:[%s2904_s18 + $0x10] ss:$8 sps:$4 sm:$0xff]   ;;  %v2213_v8 = vld [vmem:[%s2904_s18 + $0x24] ss:$8 sps:$4 sm:$0xff]  }
 0x1a6   : > { %763 = vmatprep.subr.bf16.mxu0 %v2207_v3  ;;  %2012 = vmatprep.subr.bf16.mxu1 %v2207_v3  ;;  %v2215_v9 = vld [vmem:[%s2904_s18 + $0x20] ss:$8 sps:$4 sm:$0xff]   ;;  %v2216_v10 = vld [vmem:[%s2904_s18 + $0x34] ss:$8 sps:$4 sm:$0xff]   ;;  %v2218_v11 = vld [vmem:[%s2904_s18 + $0x30] ss:$8 sps:$4 sm:$0xff]  }
 0x1a7   : > { %764 = vmatpush1.bf16.msra.mxu0 %v2209_v4  ;;  %2020 = vmatpush1.bf16.msra.mxu1 %v2209_v4  ;;  %v2219_v12 = vld [vmem:[%s2904_s18 + $0x44] ss:$8 sps:$4 sm:$0xff]   ;;  %v2221_v13 = vld [vmem:[%s2904_s18 + $0x40] ss:$8 sps:$4 sm:$0xff]   ;;  %v2222_v14 = vld [vmem:[%s2904_s18 + $0x54] ss:$8 sps:$4 sm:$0xff]  }
 0x1a8   : > { %765 = vmatprep.subr.bf16.mxu0 %v2210_v6  ;;  %2013 = vmatprep.subr.bf16.mxu1 %v2210_v6  ;;  %v2224_v15 = vld [vmem:[%s2904_s18 + $0x50] ss:$8 sps:$4 sm:$0xff]   ;;  %v2225_v16 = vld [vmem:[%s2904_s18 + $0x64] ss:$8 sps:$4 sm:$0xff]   ;;  %v2227_v17 = vld [vmem:[%s2904_s18 + $0x60] ss:$8 sps:$4 sm:$0xff]  }
 0x1a9   : > { %2205 = vset.pattern.permute.xlu0 %v2591_v5  ;;  %2206 = vset.pattern.permute.xlu1 %v2591_v5  ;;  %v2228_v18 = vld [vmem:[%s2904_s18 + $0x74] ss:$8 sps:$4 sm:$0xff]   ;;  %v2230_v19 = vld [vmem:[%s2904_s18 + $0x70] ss:$8 sps:$4 sm:$0xff]   ;;  %v631_v20 = vld [vmem:[#allocation2] sm:$0xff]  ;;  %v674_v45 = vshrl.u32 %v673_v44, 7 }
 0x1aa   : > { %v632_v21 = vld [vmem:[#allocation2 + $0x8] sm:$0xff]  ;;  %v639_v22 = vld [vmem:[#allocation2 + $0x40] sm:$0xff]  ;;  %v634_v27 = vld [vmem:[#allocation2 + $0x18] sm:$0xff]  ;;  %v912_v46 = vand.u32 127, %v673_v44  ;;  %s1945_s21 = sshll.u32 %s2563_s24, 8  ;;  %vm1352_vm3 = vcmask 7168  }
 0x1ab   : > { %766 = vmatpush1.bf16.msra.mxu0 %v2212_v7  ;;  %2021 = vmatpush1.bf16.msra.mxu1 %v2212_v7  ;;  %v640_v23 = vld [vmem:[#allocation2 + $0x48] sm:$0xff]  ;;  %v647_v24 = vpack.c.bf16 %v632_v21, %v631_v20  ;;  %v641_v28 = vld [vmem:[#allocation2 + $0x50] sm:$0xff]  ;;  %v642_v29 = vld [vmem:[#allocation2 + $0x58] sm:$0xff]  ;;  %v648_v30 = vpack.c.bf16 %v634_v27, %v633_v26  ;;  %v675_v47 = vsub.s32 0, %v674_v45  ;;  %v915_v49 = vstv %s1945_s21  ;;  %s3010_s10 = scalar_lea.vmem [#allocation3], %s1945_s21  ;;  %p1936_p3 = scmp.ne.s32.totalorder %s2563_s24, 1 }
 0x1ac   : > { %767 = vmatprep.subr.bf16.mxu0 %v2213_v8  ;;  %2014 = vmatprep.subr.bf16.mxu1 %v2213_v8  ;;  %v651_v25 = vpack.c.bf16 %v640_v23, %v639_v22  ;;  %v652_v31 = vpack.c.bf16 %v642_v29, %v641_v28  ;;  %v635_v32 = vld [vmem:[#allocation2 + $0x20] sm:$0xff]  ;;  %v636_v33 = vld [vmem:[#allocation2 + $0x28] sm:$0xff]  ;;  %v637_v38 = vld [vmem:[#allocation2 + $0x30] sm:$0xff]  ;;  %v913_v48 = vadd.s32 128, %v912_v46  ;;  %v679_v51 = vsub.s32 1, %v674_v45 }
 0x1ad   : > { %v643_v34 = vld [vmem:[#allocation2 + $0x60] sm:$0xff]  ;;  %v644_v35 = vld [vmem:[#allocation2 + $0x68] sm:$0xff]  ;;  %v649_v36 = vpack.c.bf16 %v636_v33, %v635_v32  ;;  %v638_v39 = vld [vmem:[#allocation2 + $0x38] sm:$0xff]  ;;  %v2996_v52 = vadd.s32 %v915_v49, %v912_v46 }
 0x1ae   : > { %v653_v37 = vpack.c.bf16 %v644_v35, %v643_v34  ;;  %v645_v40 = vld [vmem:[#allocation2 + $0x70] sm:$0xff]  ;;  %v646_v41 = vld [vmem:[#allocation2 + $0x78] sm:$0xff]  ;;  %v650_v42 = vpack.c.bf16 %v638_v39, %v637_v38  ;;  %v671_v50 = vld [vmem:[%s326_s27] sm:$0x3]  ;;  %v3000_v54 = vadd.s32 %v915_v49, %v913_v48 }
 0x1af   : > { %768 = vmatpush1.bf16.msra.mxu0 %v2215_v9  ;;  %2022 = vmatpush1.bf16.msra.mxu1 %v2215_v9  ;;  %v654_v43 = vpack.c.bf16 %v646_v41, %v645_v40  ;;  %v2998_v53 = vrot.slane %v671_v50, %v675_v47  ;;  %v3002_v55 = vrot.slane %v671_v50, %v679_v51  ;;  %vm918_vm1 = vcmp.lt.s32.totalorder %v2996_v52, 300 }
 0x1b0   : > { %769 = vmatprep.subr.bf16.mxu0 %v2216_v10  ;;  %2015 = vmatprep.subr.bf16.mxu1 %v2216_v10  ;;  %vm919_vm2 = vcmp.lt.s32.totalorder %v3000_v54, 300 }
 0x1b3   : > { %770 = vmatpush1.bf16.msra.mxu0 %v2218_v11  ;;  %2023 = vmatpush1.bf16.msra.mxu1 %v2218_v11 }
 0x1b4   : > { %771 = vmatprep.subr.bf16.mxu0 %v2219_v12  ;;  %2016 = vmatprep.subr.bf16.mxu1 %v2219_v12 }
 0x1b7   : > { %772 = vmatpush1.bf16.msra.mxu0 %v2221_v13  ;;  %2024 = vmatpush1.bf16.msra.mxu1 %v2221_v13 }
 0x1b8   : > { %773 = vmatprep.subr.bf16.mxu0 %v2222_v14  ;;  %2017 = vmatprep.subr.bf16.mxu1 %v2222_v14 }
 0x1bb   : > { %774 = vmatpush1.bf16.msra.mxu0 %v2224_v15  ;;  %2025 = vmatpush1.bf16.msra.mxu1 %v2224_v15 }
 0x1bc   : > { %775 = vmatprep.subr.bf16.mxu0 %v2225_v16  ;;  %2018 = vmatprep.subr.bf16.mxu1 %v2225_v16 }
 0x1bf   : > { %776 = vmatpush1.bf16.msra.mxu0 %v2227_v17  ;;  %2026 = vmatpush1.bf16.msra.mxu1 %v2227_v17 }
 0x1c0   : > { %777 = vmatprep.subr.bf16.mxu0 %v2228_v18  ;;  %2019 = vmatprep.subr.bf16.mxu1 %v2228_v18 }
 0x1c3   : > { %778 = vmatpush1.bf16.msra.mxu0 %v2230_v19  ;;  %2027 = vmatpush1.bf16.msra.mxu1 %v2230_v19 }
 0x1c6   : > { %796 = vmatmul.mubr.bf16.vlgmr.msra.gmra.mrb[0].mxu0 %v647_v24  ;;  %836 = vmatmul.mubr.bf16.vlgmr.msra.gmra.mrb[0].mxu1 %v651_v25 }
 0x1c7   : > { %805 = vmatprep.mubr.bf16.mxu0 %v2591_v5  ;;  %845 = vmatprep.mubr.bf16.mxu1 %v2591_v5 }
 0x1ce   : > { %806 = vmatmul.mubr.bf16.gmra.mrb[4].mxu0 %v648_v30  ;;  %846 = vmatmul.mubr.bf16.gmra.mrb[4].mxu1 %v652_v31 }
 0x1cf   : > { %815 = vmatprep.mubr.bf16.mxu0 %v2591_v5  ;;  %855 = vmatprep.mubr.bf16.mxu1 %v2591_v5 }
 0x1d6   : > { %816 = vmatmul.mubr.bf16.gmra.mrb[8].mxu0 %v649_v36  ;;  %856 = vmatmul.mubr.bf16.gmra.mrb[8].mxu1 %v653_v37 }
 0x1d7   : > { %825 = vmatprep.mubr.bf16.mxu0 %v2591_v5  ;;  %865 = vmatprep.mubr.bf16.mxu1 %v2591_v5 }
 0x1de   : > { %826 = vmatmul.mubr.bf16.gmra.mrb[12].mxu0 %v650_v42  ;;  %866 = vmatmul.mubr.bf16.gmra.mrb[12].mxu1 %v654_v43 }
 0x299   : > { %v797_v56 = vpop.f32.mrb[0].mxu0  ;;  %v837_v57 = vpop.f32.mrb[0].mxu1 }
 0x29a   : > { %v798_v58 = vadd.f32 %v797_v56, %v2998_v53  ;;  %v799_v59 = vpop.f32.mrb[1].mxu0  ;;  %v838_v60 = vadd.f32 %v837_v57, %v2998_v53  ;;  %v839_v61 = vpop.f32.mrb[1].mxu1 }
 0x29b   : > { %v800_v62 = vadd.f32 %v799_v59, %v3002_v55  ;;  %v801_v63 = vpop.f32.mrb[2].mxu0  ;;  %v840_v0 = vadd.f32 %v839_v61, %v3002_v55  ;;  %v841_v1 = vpop.f32.mrb[2].mxu1 }
 0x29c   : > { %879 = vst [vmem:[%s3010_s10] sm:$0xff] %v798_v58  ;;  %895 = vst [vmem:[%s3010_s10 + $0x80] sm:$0xff] %v838_v60  ;;  %v802_v2 = vadd.f32 %v801_v63, %v2998_v53  ;;  %v803_v3 = vpop.f32.mrb[3].mxu0  ;;  %v842_v4 = vadd.f32 %v841_v1, %v2998_v53  ;;  %v843_v5 = vpop.f32.mrb[3].mxu1  ;;  %v3018_v6 = vsel %vm918_vm1, %v798_v58, -inf  ;;  %v3022_v7 = vsel %vm918_vm1, %v838_v60, -inf }
 0x29d   : > { %880 = vst [vmem:[%s3010_s10 + $0x8] sm:$0xff] %v800_v62  ;;  %896 = vst [vmem:[%s3010_s10 + $0x88] sm:$0xff] %v840_v0  ;;  %v804_v8 = vadd.f32 %v803_v3, %v3002_v55  ;;  %v844_v9 = vadd.f32 %v843_v5, %v3002_v55  ;;  %v3030_v10 = vsel %vm919_vm2, %v800_v62, -inf  ;;  %v3034_v11 = vsel %vm919_vm2, %v840_v0, -inf }
 0x29e   : > { %881 = vst [vmem:[%s3010_s10 + $0x10] sm:$0xff] %v802_v2  ;;  %897 = vst [vmem:[%s3010_s10 + $0x90] sm:$0xff] %v842_v4  ;;  %v968_v12 = vmax.f32 %v3018_v6, %v3030_v10  ;;  %v3042_v13 = vsel %vm918_vm1, %v842_v4, -inf  ;;  %v992_v16 = vmax.f32 %v3022_v7, %v3034_v11  ;;  %v3060_v27 = vsel %vm918_vm1, %v802_v2, -inf }
 0x29f   : > { %882 = vst [vmem:[%s3010_s10 + $0x18] sm:$0xff] %v804_v8  ;;  %898 = vst [vmem:[%s3010_s10 + $0x98] sm:$0xff] %v844_v9  ;;  %v3048_v14 = vsel %vm919_vm2, %v844_v9, -inf  ;;  %v3064_v28 = vsel %vm919_vm2, %v804_v8, -inf }
 0x2a0   : > { %969 = vmax.xlane.f32.xlu0 %v968_v12  ;;  %v995_v15 = vmax.f32 %v3042_v13, %v3048_v14  ;;  %v971_v40 = vmax.f32 %v3060_v27, %v3064_v28 }
 0x2a1   : > { %v807_v17 = vpop.f32.mrb[4].mxu0  ;;  %v847_v18 = vpop.f32.mrb[4].mxu1 }
 0x2a2   : > { %v808_v19 = vadd.f32 %v807_v17, %v2998_v53  ;;  %v809_v20 = vpop.f32.mrb[5].mxu0  ;;  %996 = vmax.xlane.f32.xlu1 %v995_v15  ;;  %v848_v21 = vadd.f32 %v847_v18, %v2998_v53  ;;  %v849_v22 = vpop.f32.mrb[5].mxu1 }
 0x2a3   : > { %v810_v23 = vadd.f32 %v809_v20, %v3002_v55  ;;  %v811_v24 = vpop.f32.mrb[6].mxu0  ;;  %v850_v25 = vadd.f32 %v849_v22, %v3002_v55  ;;  %v851_v26 = vpop.f32.mrb[6].mxu1 }
 0x2a4   : > { %883 = vst [vmem:[%s3010_s10 + $0x20] sm:$0xff] %v808_v19  ;;  %v812_v29 = vadd.f32 %v811_v24, %v2998_v53  ;;  %993 = vmax.xlane.f32.xlu0 %v992_v16  ;;  %v813_v30 = vpop.f32.mrb[7].mxu0  ;;  %899 = vst [vmem:[%s3010_s10 + $0xa0] sm:$0xff] %v848_v21  ;;  %v852_v31 = vadd.f32 %v851_v26, %v2998_v53  ;;  %v3072_v32 = vsel %vm918_vm1, %v808_v19, -inf  ;;  %v853_v33 = vpop.f32.mrb[7].mxu1  ;;  %v3076_v34 = vsel %vm918_vm1, %v848_v21, -inf }
 0x2a5   : > { %884 = vst [vmem:[%s3010_s10 + $0x28] sm:$0xff] %v810_v23  ;;  %v814_v35 = vadd.f32 %v813_v30, %v3002_v55  ;;  %900 = vst [vmem:[%s3010_s10 + $0xa8] sm:$0xff] %v850_v25  ;;  %v3083_v36 = vsel %vm919_vm2, %v810_v23, -inf  ;;  %v854_v37 = vadd.f32 %v853_v33, %v3002_v55  ;;  %v3088_v38 = vsel %vm919_vm2, %v850_v25, -inf }
 0x2a6   : > { %885 = vst [vmem:[%s3010_s10 + $0x30] sm:$0xff] %v812_v29  ;;  %901 = vst [vmem:[%s3010_s10 + $0xb0] sm:$0xff] %v852_v31  ;;  %v974_v39 = vmax.f32 %v3072_v32, %v3083_v36  ;;  %v3098_v41 = vsel %vm918_vm1, %v812_v29, -inf  ;;  %v998_v44 = vmax.f32 %v3076_v34, %v3088_v38  ;;  %v3112_v45 = vsel %vm918_vm1, %v852_v31, -inf }
 0x2a7   : > { %886 = vst [vmem:[%s3010_s10 + $0x38] sm:$0xff] %v814_v35  ;;  %902 = vst [vmem:[%s3010_s10 + $0xb8] sm:$0xff] %v854_v37  ;;  %v3104_v42 = vsel %vm919_vm2, %v814_v35, -inf  ;;  %v3116_v46 = vsel %vm919_vm2, %v854_v37, -inf }
 0x2a8   : > { %975 = vmax.xlane.f32.xlu1 %v974_v39  ;;  %972 = vmax.xlane.f32.xlu0 %v971_v40  ;;  %v977_v43 = vmax.f32 %v3098_v41, %v3104_v42  ;;  %v1001_v60 = vmax.f32 %v3112_v45, %v3116_v46 }
 0x2a9   : > { %v817_v47 = vpop.f32.mrb[8].mxu0  ;;  %v857_v48 = vpop.f32.mrb[8].mxu1 }
 0x2aa   : > { %v818_v49 = vadd.f32 %v817_v47, %v2998_v53  ;;  %v819_v50 = vpop.f32.mrb[9].mxu0  ;;  %v858_v51 = vadd.f32 %v857_v48, %v2998_v53  ;;  %v859_v56 = vpop.f32.mrb[9].mxu1 }
 0x2ab   : > { %v820_v57 = vadd.f32 %v819_v50, %v3002_v55  ;;  %v821_v58 = vpop.f32.mrb[10].mxu0  ;;  %v860_v59 = vadd.f32 %v859_v56, %v3002_v55  ;;  %v861_v61 = vpop.f32.mrb[10].mxu1 }
 0x2ac   : > { %887 = vst [vmem:[%s3010_s10 + $0x40] sm:$0xff] %v818_v49  ;;  %978 = vmax.xlane.f32.xlu1 %v977_v43  ;;  %v822_v62 = vadd.f32 %v821_v58, %v2998_v53  ;;  %v823_v63 = vpop.f32.mrb[11].mxu0  ;;  %903 = vst [vmem:[%s3010_s10 + $0xc0] sm:$0xff] %v858_v51  ;;  %999 = vmax.xlane.f32.xlu0 %v998_v44  ;;  %v862_v0 = vadd.f32 %v861_v61, %v2998_v53  ;;  %v863_v1 = vpop.f32.mrb[11].mxu1  ;;  %v3130_v2 = vsel %vm918_vm1, %v818_v49, -inf }
 0x2ad   : > { %v3134_v3 = vsel %vm918_vm1, %v858_v51, -inf  ;;  %888 = vst [vmem:[%s3010_s10 + $0x48] sm:$0xff] %v820_v57  ;;  %v824_v4 = vadd.f32 %v823_v63, %v3002_v55  ;;  %904 = vst [vmem:[%s3010_s10 + $0xc8] sm:$0xff] %v860_v59  ;;  %v864_v5 = vadd.f32 %v863_v1, %v3002_v55  ;;  %v3142_v8 = vsel %vm919_vm2, %v820_v57, -inf }
 0x2ae   : > { %v3146_v9 = vsel %vm919_vm2, %v860_v59, -inf  ;;  %889 = vst [vmem:[%s3010_s10 + $0x50] sm:$0xff] %v822_v62  ;;  %905 = vst [vmem:[%s3010_s10 + $0xd0] sm:$0xff] %v862_v0  ;;  %v3152_v12 = vsel %vm918_vm1, %v822_v62, -inf  ;;  %v980_v15 = vmax.f32 %v3130_v2, %v3142_v8  ;;  %v3166_v18 = vsel %vm918_vm1, %v862_v0, -inf  ;;  %v3232_v62 = vld [vmem:[#allocation4] sm:$0xff] }
 0x2af   : > { %890 = vst [vmem:[%s3010_s10 + $0x58] sm:$0xff] %v824_v4  ;;  %906 = vst [vmem:[%s3010_s10 + $0xd8] sm:$0xff] %v864_v5  ;;  %v3160_v16 = vsel %vm919_vm2, %v824_v4, -inf  ;;  %v3170_v19 = vsel %vm919_vm2, %v864_v5, -inf  ;;  %v1004_v20 = vmax.f32 %v3134_v3, %v3146_v9  ;;  %v3234_v0 = vld [vmem:[#allocation4 + $0x48] sm:$0xff]  ;;  %v3239_v4 = vld [vmem:[#allocation4 + $0x40] sm:$0xff] }
 0x2b0   : > { %1002 = vmax.xlane.f32.xlu1 %v1001_v60  ;;  %v983_v17 = vmax.f32 %v3152_v12, %v3160_v16  ;;  %981 = vmax.xlane.f32.xlu0 %v980_v15  ;;  %v1007_v33 = vmax.f32 %v3166_v18, %v3170_v19 }
 0x2b1   : > { %v827_v21 = vpop.f32.mrb[12].mxu0  ;;  %v867_v22 = vpop.f32.mrb[12].mxu1 }
 0x2b2   : > { %v828_v23 = vadd.f32 %v827_v21, %v2998_v53  ;;  %v829_v24 = vpop.f32.mrb[13].mxu0  ;;  %v868_v25 = vadd.f32 %v867_v22, %v2998_v53  ;;  %v869_v26 = vpop.f32.mrb[13].mxu1  ;;  %v3256_v21 = vld [vmem:[#allocation4 + $0x10] sm:$0xff]  ;;  %v3258_v22 = vld [vmem:[#allocation4 + $0x8] sm:$0xff] }
 0x2b3   : > { %v830_v29 = vadd.f32 %v829_v24, %v3002_v55  ;;  %v831_v30 = vpop.f32.mrb[14].mxu0  ;;  %v870_v31 = vadd.f32 %v869_v26, %v3002_v55  ;;  %v871_v35 = vpop.f32.mrb[14].mxu1 }
 0x2b4   : > { %891 = vst [vmem:[%s3010_s10 + $0x60] sm:$0xff] %v828_v23  ;;  %984 = vmax.xlane.f32.xlu1 %v983_v17  ;;  %v832_v37 = vadd.f32 %v831_v30, %v2998_v53  ;;  %v833_v39 = vpop.f32.mrb[15].mxu0  ;;  %907 = vst [vmem:[%s3010_s10 + $0xe0] sm:$0xff] %v868_v25  ;;  %v872_v40 = vadd.f32 %v871_v35, %v2998_v53  ;;  %v873_v43 = vpop.f32.mrb[15].mxu1  ;;  %1005 = vmax.xlane.f32.xlu0 %v1004_v20  ;;  %v3186_v44 = vsel %vm918_vm1, %v828_v23, -inf  ;;  %v3272_v30 = vld [vmem:[#allocation4 + $0x18] sm:$0xff] }
 0x2b5   : > { %v3190_v47 = vsel %vm918_vm1, %v868_v25, -inf  ;;  %892 = vst [vmem:[%s3010_s10 + $0x68] sm:$0xff] %v830_v29  ;;  %v834_v48 = vadd.f32 %v833_v39, %v3002_v55  ;;  %908 = vst [vmem:[%s3010_s10 + $0xe8] sm:$0xff] %v870_v31  ;;  %v874_v49 = vadd.f32 %v873_v43, %v3002_v55  ;;  %v3198_v53 = vsel %vm919_vm2, %v830_v29, -inf  ;;  %v3351_v23 = vld [vmem:[#allocation4 + $0x70] sm:$0xff] }
 0x2b6   : > { %v3202_v50 = vsel %vm919_vm2, %v870_v31, -inf  ;;  %893 = vst [vmem:[%s3010_s10 + $0x70] sm:$0xff] %v832_v37  ;;  %909 = vst [vmem:[%s3010_s10 + $0xf0] sm:$0xff] %v872_v40  ;;  %v3208_v51 = vsel %vm918_vm1, %v832_v37, -inf  ;;  %v986_v56 = vmax.f32 %v3186_v44, %v3198_v53  ;;  %v3224_v59 = vsel %vm918_vm1, %v872_v40, -inf  ;;  %v3274_v31 = vld [vmem:[#allocation4 + $0x50] sm:$0xff] }
 0x2b7   : > { %894 = vst [vmem:[%s3010_s10 + $0x78] sm:$0xff] %v834_v48  ;;  %910 = vst [vmem:[%s3010_s10 + $0xf8] sm:$0xff] %v874_v49  ;;  %v3216_v55 = vsel %vm919_vm2, %v834_v48, -inf  ;;  %v1010_v58 = vmax.f32 %v3190_v47, %v3202_v50  ;;  %v3228_v60 = vsel %vm919_vm2, %v874_v49, -inf  ;;  %v3291_v48 = vld [vmem:[#allocation4 + $0x58] sm:$0xff]  ;;  %v3293_v49 = vld [vmem:[#allocation4 + $0x20] sm:$0xff] }
 0x2b8   : > { %1008 = vmax.xlane.f32.xlu1 %v1007_v33  ;;  %v989_v57 = vmax.f32 %v3208_v51, %v3216_v55  ;;  %987 = vmax.xlane.f32.xlu0 %v986_v56  ;;  %v1013_v61 = vmax.f32 %v3224_v59, %v3228_v60  ;;  %v3330_v56 = vld [vmem:[#allocation4 + $0x68] sm:$0xff]  ;;  %v3349_v33 = vld [vmem:[#allocation4 + $0x38] sm:$0xff]  ;;  %3706 = vst [vmem:[#allocation37_spill] sm:$0xff] %v3351_v23 }
 0x2b9   : > { %3701 = vst [vmem:[#allocation32_spill] sm:$0xff] %v3330_v56  ;;  %3705 = vst [vmem:[#allocation36_spill] sm:$0xff] %v3349_v33 }
 0x2bc   : > { %990 = vmax.xlane.f32.xlu1 %v989_v57  ;;  %1011 = vmax.xlane.f32.xlu0 %v1010_v58  ;;  %v3332_v57 = vld [vmem:[#allocation4 + $0x30] sm:$0xff] }
 0x2bd   : > { %3702 = vst [vmem:[#allocation33_spill] sm:$0xff] %v3332_v57 }
 0x2c0   : > { %1014 = vmax.xlane.f32.xlu1 %v1013_v61 }
 0x32d   : > { %v970_v63 = vpop.xlane.xlu0 %969 }
 0x32e   : > { %v3237_v52 = vmax.f32 %v3232_v62, %v970_v63 }
 0x32f   : > { %v997_v1 = vpop.xlane.xlu1 %996 }
 0x330   : > { %1369 = vst.msk [vmem:[#allocation4] sm:$0xff] %vm1352_vm3, %v3237_v52  ;;  %v3246_v5 = vmax.f32 %v3234_v0, %v997_v1  ;;  %1114 = vperm.xlu0 %2205, %v3237_v52  }
 0x331   : > { %v994_v15 = vpop.xlane.xlu0 %993 }
 0x332   : > { %1378 = vst.msk [vmem:[#allocation4 + $0x48] sm:$0xff] %vm1352_vm3, %v3246_v5  ;;  %v3254_v20 = vmax.f32 %v3239_v4, %v994_v15  ;;  %v3310_v15 = vld [vmem:[#allocation4 + $0x28] sm:$0xff] }
 0x333   : > { %3697 = vst [vmem:[#allocation28_spill] sm:$0xff] %v3310_v15 }
 0x334   : > { %1377 = vst.msk [vmem:[#allocation4 + $0x40] sm:$0xff] %vm1352_vm3, %v3254_v20  ;;  %1159 = vperm.xlu0 %2205, %v3246_v5   ;;  %1154 = vperm.xlu1 %2206, %v3254_v20  }
 0x335   : > { %v976_v24 = vpop.xlane.xlu1 %975  ;;  %v973_v25 = vpop.xlane.xlu0 %972 }
 0x336   : > { %v3267_v26 = vmax.f32 %v3256_v21, %v976_v24  ;;  %v3270_v29 = vmax.f32 %v3258_v22, %v973_v25  ;;  %v3312_v24 = vld [vmem:[#allocation4 + $0x60] sm:$0xff] }
 0x337   : > { %3698 = vst [vmem:[#allocation29_spill] sm:$0xff] %v3312_v24 }
 0x338   : > { %1371 = vst.msk [vmem:[#allocation4 + $0x10] sm:$0xff] %vm1352_vm3, %v3267_v26  ;;  %1370 = vst.msk [vmem:[#allocation4 + $0x8] sm:$0xff] %vm1352_vm3, %v3270_v29  ;;  %1119 = vperm.xlu1 %2206, %v3270_v29  }
 0x339   : > { %v979_v37 = vpop.xlane.xlu1 %978  ;;  %v1000_v39 = vpop.xlane.xlu0 %999 }
 0x33a   : > { %v3286_v40 = vmax.f32 %v3272_v30, %v979_v37  ;;  %v3289_v43 = vmax.f32 %v3274_v31, %v1000_v39 }
 0x33c   : > { %1372 = vst.msk [vmem:[#allocation4 + $0x18] sm:$0xff] %vm1352_vm3, %v3286_v40  ;;  %1124 = vperm.xlu1 %2206, %v3267_v26   ;;  %1379 = vst.msk [vmem:[#allocation4 + $0x50] sm:$0xff] %vm1352_vm3, %v3289_v43 }
 0x33d   : > { %v1003_v58 = vpop.xlane.xlu1 %1002  ;;  %v982_v61 = vpop.xlane.xlu0 %981 }
 0x33e   : > { %v3305_v63 = vmax.f32 %v3291_v48, %v1003_v58  ;;  %v3308_v1 = vmax.f32 %v3293_v49, %v982_v61 }
 0x340   : > { %3696 = vst [vmem:[#allocation27_spill] sm:$0xff] %v3308_v1  ;;  %1380 = vst.msk [vmem:[#allocation4 + $0x58] sm:$0xff] %vm1352_vm3, %v3305_v63  ;;  %1169 = vperm.xlu0 %2205, %v3305_v63   ;;  %1164 = vperm.xlu1 %2206, %v3289_v43  }
 0x341   : > { %1373 = vst.msk [vmem:[#allocation4 + $0x20] sm:$0xff] %vm1352_vm3, %v3308_v1  ;;  %v985_v39 = vpop.xlane.xlu1 %984  ;;  %v1006_v58 = vpop.xlane.xlu0 %1005 }
 0x342   : > { %v3325_v61 = vmax.f32 %v3310_v15, %v985_v39  ;;  %v3328_v25 = vmax.f32 %v3312_v24, %v1006_v58 }
 0x344   : > { %3699 = vst [vmem:[#allocation30_spill] sm:$0xff] %v3325_v61  ;;  %3700 = vst [vmem:[#allocation31_spill] sm:$0xff] %v3328_v25  ;;  %1129 = vperm.xlu1 %2206, %v3286_v40  }
 0x345   : > { %1374 = vst.msk [vmem:[#allocation4 + $0x28] sm:$0xff] %vm1352_vm3, %v3325_v61  ;;  %1381 = vst.msk [vmem:[#allocation4 + $0x60] sm:$0xff] %vm1352_vm3, %v3328_v25  ;;  %v1009_v39 = vpop.xlane.xlu1 %1008  ;;  %v988_v58 = vpop.xlane.xlu0 %987 }
 0x346   : > { %v3344_v35 = vmax.f32 %v3330_v56, %v1009_v39  ;;  %v3347_v17 = vmax.f32 %v3332_v57, %v988_v58  ;;  %v3369_v56 = vld [vmem:[#allocation4 + $0x78] sm:$0xff] }
 0x347   : > { %3709 = vst [vmem:[#allocation40_spill] sm:$0xff] %v3369_v56 }
 0x348   : > { %3703 = vst [vmem:[#allocation34_spill] sm:$0xff] %v3344_v35  ;;  %3704 = vst [vmem:[#allocation35_spill] sm:$0xff] %v3347_v17  ;;  %1179 = vperm.xlu0 %2205, %v3344_v35   ;;  %1134 = vperm.xlu1 %2206, %v3308_v1  }
 0x349   : > { %1382 = vst.msk [vmem:[#allocation4 + $0x68] sm:$0xff] %vm1352_vm3, %v3344_v35  ;;  %1375 = vst.msk [vmem:[#allocation4 + $0x30] sm:$0xff] %vm1352_vm3, %v3347_v17  ;;  %v991_v58 = vpop.xlane.xlu1 %990  ;;  %v1012_v37 = vpop.xlane.xlu0 %1011 }
 0x34a   : > { %v3364_v15 = vmax.f32 %v3349_v33, %v991_v58  ;;  %v3367_v54 = vmax.f32 %v3351_v23, %v1012_v37 }
 0x34c   : > { %3707 = vst [vmem:[#allocation38_spill] sm:$0xff] %v3364_v15  ;;  %3708 = vst [vmem:[#allocation39_spill] sm:$0xff] %v3367_v54  ;;  %1174 = vperm.xlu1 %2206, %v3328_v25  }
 0x34d   : > { %1376 = vst.msk [vmem:[#allocation4 + $0x38] sm:$0xff] %vm1352_vm3, %v3364_v15  ;;  %1383 = vst.msk [vmem:[#allocation4 + $0x70] sm:$0xff] %vm1352_vm3, %v3367_v54  ;;  %v1015_v58 = vpop.xlane.xlu1 %1014 }
 0x34e   : > { %v3381_v37 = vmax.f32 %v3369_v56, %v1015_v58 }
 0x350   : > { %3710 = vst [vmem:[#allocation41_spill] sm:$0xff] %v3381_v37  ;;  %1384 = vst.msk [vmem:[#allocation4 + $0x78] sm:$0xff] %vm1352_vm3, %v3381_v37  ;;  %1189 = vperm.xlu0 %2205, %v3381_v37   ;;  %1139 = vperm.xlu1 %2206, %v3325_v61  }
 0x354   : > { %1144 = vperm.xlu1 %2206, %v3347_v17  }
 0x358   : > { %1149 = vperm.xlu1 %2206, %v3364_v15  }
 0x35c   : > { %1184 = vperm.xlu1 %2206, %v3367_v54  }
 0x3af   : > { %v1115_v39 = vpop.permute.xlu0 %1114 }
 0x3b0   : > { %v1192_v58 = vsub.f32 %v3018_v6, %v1115_v39  ;;  %v1193_v35 = vsub.f32 %v3030_v10, %v1115_v39 }
 0x3b2   : > { %v1224_v23 = vmul.f32 1.442695, %v1192_v58  ;;  %v1226_v57 = vmul.f32 1.442695, %v1193_v35 }
 0x3b3   : > { %v1155_v56 = vpop.permute.xlu1 %1154  ;;  %v1160_v33 = vpop.permute.xlu0 %1159 }
 0x3b4   : > { %2231 = vpow2.f32 %v1224_v23  ;;  %v1208_v37 = vsub.f32 %v3022_v7, %v1155_v56  ;;  %v1209_v61 = vsub.f32 %v3034_v11, %v1155_v56  ;;  %v1210_v17 = vsub.f32 %v3042_v13, %v1160_v33 }
 0x3b5   : > { %2233 = vpow2.f32 %v1226_v57  ;;  %v1211_v15 = vsub.f32 %v3048_v14, %v1160_v33 }
 0x3b6   : > { %v1256_v54 = vmul.f32 1.442695, %v1208_v37  ;;  %v1258_v25 = vmul.f32 1.442695, %v1209_v61  ;;  %v1260_v24 = vmul.f32 1.442695, %v1210_v17 }
 0x3b7   : > { %v1262_v6 = vmul.f32 1.442695, %v1211_v15  ;;  %v1120_v1 = vpop.permute.xlu1 %1119 }
 0x3b8   : > { %2235 = vpow2.f32 %v1256_v54  ;;  %v1194_v10 = vsub.f32 %v3060_v27, %v1120_v1  ;;  %v1195_v35 = vsub.f32 %v3064_v28, %v1120_v1 }
 0x3b9   : > { %2237 = vpow2.f32 %v1258_v25 }
 0x3ba   : > { %2239 = vpow2.f32 %v1260_v24  ;;  %v1228_v7 = vmul.f32 1.442695, %v1194_v10  ;;  %v1230_v23 = vmul.f32 1.442695, %v1195_v35 }
 0x3bb   : > { %2241 = vpow2.f32 %v1262_v6  ;;  %v1125_v11 = vpop.permute.xlu1 %1124 }
 0x3bc   : > { %2243 = vpow2.f32 %v1228_v7  ;;  %v1196_v13 = vsub.f32 %v3072_v32, %v1125_v11  ;;  %v1197_v14 = vsub.f32 %v3083_v36, %v1125_v11 }
 0x3bd   : > { %2245 = vpow2.f32 %v1230_v23 }
 0x3be   : > { %v2232_v17 = vpop.eup %2231  ;;  %v1232_v33 = vmul.f32 1.442695, %v1196_v13  ;;  %v1234_v56 = vmul.f32 1.442695, %v1197_v14 }
 0x3bf   : > { %v2234_v54 = vpop.eup %2233  ;;  %v1165_v57 = vpop.permute.xlu1 %1164 }
 0x3c0   : > { %v1170_v27 = vpop.permute.xlu0 %1169  ;;  %2247 = vpow2.f32 %v1232_v33  ;;  %v1212_v28 = vsub.f32 %v3076_v34, %v1165_v57  ;;  %v1213_v1 = vsub.f32 %v3088_v38, %v1165_v57  ;;  %v1288_v24 = vadd.f32 %v2234_v54, %v2232_v17 }
 0x3c1   : > { %v1214_v15 = vsub.f32 %v3112_v45, %v1170_v27  ;;  %2249 = vpow2.f32 %v1234_v56  ;;  %v1215_v36 = vsub.f32 %v3116_v46, %v1170_v27 }
 0x3c2   : > { %v2236_v25 = vpop.eup %2235  ;;  %v1264_v32 = vmul.f32 1.442695, %v1212_v28  ;;  %v1266_v61 = vmul.f32 1.442695, %v1213_v1  ;;  %1289 = vadd.xlane.f32.xlu1 %v1288_v24 }
 0x3c3   : > { %v2238_v39 = vpop.eup %2237  ;;  %v1268_v37 = vmul.f32 1.442695, %v1214_v15  ;;  %v1130_v58 = vpop.permute.xlu1 %1129  ;;  %v1270_v7 = vmul.f32 1.442695, %v1215_v36 }
 0x3c4   : > { %v2240_v6 = vpop.eup %2239  ;;  %2251 = vpow2.f32 %v1264_v32  ;;  %v1198_v10 = vsub.f32 %v3098_v41, %v1130_v58  ;;  %v1199_v34 = vsub.f32 %v3104_v42, %v1130_v58  ;;  %v1312_v38 = vadd.f32 %v2238_v39, %v2236_v25 }
 0x3c5   : > { %v2242_v35 = vpop.eup %2241  ;;  %2253 = vpow2.f32 %v1266_v61 }
 0x3c6   : > { %v2244_v45 = vpop.eup %2243  ;;  %v1236_v23 = vmul.f32 1.442695, %v1198_v10  ;;  %v1238_v11 = vmul.f32 1.442695, %v1199_v34  ;;  %1313 = vadd.xlane.f32.xlu0 %v1312_v38  ;;  %v1315_v13 = vadd.f32 %v2242_v35, %v2240_v6  ;;  %2255 = vpow2.f32 %v1268_v37 }
 0x3c7   : > { %v2246_v46 = vpop.eup %2245  ;;  %v1135_v14 = vpop.permute.xlu1 %1134 }
 0x3c8   : > { %2257 = vpow2.f32 %v1236_v23  ;;  %1316 = vadd.xlane.f32.xlu1 %v1315_v13  ;;  %v1200_v17 = vsub.f32 %v3130_v2, %v1135_v14  ;;  %v1201_v41 = vsub.f32 %v3142_v8, %v1135_v14  ;;  %v1291_v42 = vadd.f32 %v2246_v46, %v2244_v45  ;;  %v1180_v27 = vpop.permute.xlu0 %1179 }
 0x3c9   : > { %2259 = vpow2.f32 %v1238_v11  ;;  %v1218_v8 = vsub.f32 %v3166_v18, %v1180_v27  ;;  %v1219_v36 = vsub.f32 %v3170_v19, %v1180_v27 }
 0x3ca   : > { %v2248_v33 = vpop.eup %2247  ;;  %2261 = vpow2.f32 %v1270_v7  ;;  %v1240_v56 = vmul.f32 1.442695, %v1200_v17  ;;  %v1242_v54 = vmul.f32 1.442695, %v1201_v41  ;;  %1292 = vadd.xlane.f32.xlu0 %v1291_v42 }
 0x3cb   : > { %v2250_v57 = vpop.eup %2249  ;;  %v1175_v28 = vpop.permute.xlu1 %1174  ;;  %v1276_v10 = vmul.f32 1.442695, %v1218_v8  ;;  %v1278_v35 = vmul.f32 1.442695, %v1219_v36 }
 0x3cc   : > { %2263 = vpow2.f32 %v1240_v56  ;;  %v1216_v1 = vsub.f32 %v3134_v3, %v1175_v28  ;;  %v1217_v15 = vsub.f32 %v3146_v9, %v1175_v28  ;;  %v1294_v24 = vadd.f32 %v2250_v57, %v2248_v33 }
 0x3cd   : > { %2265 = vpow2.f32 %v1242_v54 }
 0x3ce   : > { %v2252_v2 = vpop.eup %2251  ;;  %v1272_v25 = vmul.f32 1.442695, %v1216_v1  ;;  %v1274_v32 = vmul.f32 1.442695, %v1217_v15  ;;  %1295 = vadd.xlane.f32.xlu0 %v1294_v24 }
 0x3cf   : > { %v2254_v61 = vpop.eup %2253  ;;  %v1140_v39 = vpop.permute.xlu1 %1139 }
 0x3d0   : > { %2267 = vpow2.f32 %v1272_v25  ;;  %v1202_v37 = vsub.f32 %v3152_v12, %v1140_v39  ;;  %v1203_v58 = vsub.f32 %v3160_v16, %v1140_v39  ;;  %v2256_v3 = vpop.eup %2255  ;;  %v1318_v9 = vadd.f32 %v2254_v61, %v2252_v2  ;;  %v1190_v45 = vpop.permute.xlu0 %1189 }
 0x3d1   : > { %2269 = vpow2.f32 %v1274_v32  ;;  %v1222_v13 = vsub.f32 %v3224_v59, %v1190_v45  ;;  %v1223_v41 = vsub.f32 %v3228_v60, %v1190_v45  ;;  %v3711_v45 = vsub.f32 %v3232_v62, %v3237_v52 }
 0x3d2   : > { %v2258_v6 = vpop.eup %2257  ;;  %v1244_v34 = vmul.f32 1.442695, %v1202_v37  ;;  %v1246_v38 = vmul.f32 1.442695, %v1203_v58  ;;  %1319 = vadd.xlane.f32.xlu0 %v1318_v9 }
 0x3d3   : > { %v2260_v18 = vpop.eup %2259  ;;  %v1145_v7 = vpop.permute.xlu1 %1144  ;;  %v1284_v57 = vmul.f32 1.442695, %v1222_v13  ;;  %v1286_v1 = vmul.f32 1.442695, %v1223_v41 }
 0x3d4   : > { %v2262_v19 = vpop.eup %2261  ;;  %2271 = vpow2.f32 %v1244_v34  ;;  %v1204_v23 = vsub.f32 %v3186_v44, %v1145_v7  ;;  %v1205_v12 = vsub.f32 %v3198_v53, %v1145_v7  ;;  %v1297_v11 = vadd.f32 %v2260_v18, %v2258_v6 }
 0x3d5   : > { %2273 = vpow2.f32 %v1246_v38  ;;  %v1321_v33 = vadd.f32 %v2262_v19, %v2256_v3  ;;  %v1064_v7 = vmul.f32 1.442695, %v3711_v45  ;;  %v3712_v19 = vsub.f32 %v3239_v4, %v3254_v20 }
 0x3d6   : > { %v2264_v16 = vpop.eup %2263  ;;  %2275 = vpow2.f32 %v1276_v10  ;;  %v1248_v46 = vmul.f32 1.442695, %v1204_v23  ;;  %v1250_v14 = vmul.f32 1.442695, %v1205_v12  ;;  %1298 = vadd.xlane.f32.xlu1 %v1297_v11  ;;  %v3713_v12 = vsub.f32 %v3234_v0, %v3246_v5 }
 0x3d7   : > { %v2266_v17 = vpop.eup %2265  ;;  %2277 = vpow2.f32 %v1278_v35  ;;  %v1150_v42 = vpop.permute.xlu1 %1149  ;;  %v1080_v23 = vmul.f32 1.442695, %v3712_v19  ;;  %v3716_v4 = vsub.f32 %v3274_v31, %v3289_v43  ;;  %v3718_v31 = vsub.f32 %v3291_v48, %v3305_v63  ;;  %v1034_v48 = vld [vmem:[#allocation5 + $0x10] sm:$0xff] }
 0x3d8   : > { %2279 = vpow2.f32 %v1248_v46  ;;  %v1206_v44 = vsub.f32 %v3208_v51, %v1150_v42  ;;  %v1207_v53 = vsub.f32 %v3216_v55, %v1150_v42  ;;  %v1300_v56 = vadd.f32 %v2266_v17, %v2264_v16  ;;  %v1040_v17 = vld [vmem:[#allocation5 + $0x40] sm:$0xff]  ;;  %v3721_v63 = vld [vmem:[#allocation29_spill] sm:$0xff] }
 0x3d9   : > { %2281 = vpow2.f32 %v1250_v14  ;;  %v1082_v11 = vmul.f32 1.442695, %v3713_v12  ;;  %v3714_v16 = vsub.f32 %v3258_v22, %v3270_v29  ;;  %v3715_v46 = vsub.f32 %v3256_v21, %v3267_v26  ;;  %v1032_v14 = vld [vmem:[#allocation5] sm:$0xff]  ;;  %v1041_v21 = vld [vmem:[#allocation5 + $0x48] sm:$0xff] }
 0x3da   : > { %v2268_v54 = vpop.eup %2267  ;;  %v1252_v27 = vmul.f32 1.442695, %v1206_v44  ;;  %v1254_v59 = vmul.f32 1.442695, %v1207_v53  ;;  %1301 = vadd.xlane.f32.xlu0 %v1300_v56  ;;  %1322 = vadd.xlane.f32.xlu1 %v1321_v33  ;;  %v1084_v20 = vmul.f32 1.442695, %v3716_v4  ;;  %v3717_v22 = vsub.f32 %v3272_v30, %v3286_v40 }
 0x3db   : > { %v2270_v28 = vpop.eup %2269  ;;  %v1185_v15 = vpop.permute.xlu1 %1184  ;;  %v1066_v13 = vmul.f32 1.442695, %v3714_v16  ;;  %v1068_v62 = vmul.f32 1.442695, %v3715_v46  ;;  %v1086_v43 = vmul.f32 1.442695, %v3718_v31 }
 0x3dc   : > { %2283 = vpow2.f32 %v1252_v27  ;;  %v1220_v60 = vsub.f32 %v3190_v47, %v1185_v15  ;;  %v1221_v24 = vsub.f32 %v3202_v50, %v1185_v15  ;;  %v1324_v2 = vadd.f32 %v2270_v28, %v2268_v54  ;;  %v3719_v27 = vld [vmem:[#allocation27_spill] sm:$0xff]  ;;  %v3739_v31 = vld [vmem:[#allocation40_spill] sm:$0xff] }
 0x3dd   : > { %2285 = vpow2.f32 %v1254_v59  ;;  %v1070_v29 = vmul.f32 1.442695, %v3717_v22  ;;  %v3720_v30 = vsub.f32 %v3293_v49, %v3719_v27  ;;  %v1036_v46 = vld [vmem:[#allocation5 + $0x20] sm:$0xff] }
 0x3de   : > { %v2272_v51 = vpop.eup %2271  ;;  %2287 = vpow2.f32 %v1284_v57  ;;  %v1280_v55 = vmul.f32 1.442695, %v1220_v60  ;;  %v1282_v8 = vmul.f32 1.442695, %v1221_v24  ;;  %1325 = vadd.xlane.f32.xlu0 %v1324_v2  ;;  %v1033_v57 = vld [vmem:[#allocation5 + $0x8] sm:$0xff]  ;;  %v3722_v24 = vld [vmem:[#allocation31_spill] sm:$0xff] }
 0x3df   : > { %v2274_v25 = vpop.eup %2273  ;;  %2289 = vpow2.f32 %v1286_v1  ;;  %v1072_v40 = vmul.f32 1.442695, %v3720_v30  ;;  %v3723_v2 = vsub.f32 %v3721_v63, %v3722_v24  ;;  %v1044_v22 = vld [vmem:[#allocation5 + $0x60] sm:$0xff]  ;;  %v1038_v63 = vld [vmem:[#allocation5 + $0x30] sm:$0xff] }
 0x3e0   : > { %v2276_v32 = vpop.eup %2275  ;;  %2291 = vpow2.f32 %v1280_v55  ;;  %v1303_v61 = vadd.f32 %v2274_v25, %v2272_v51 }
 0x3e1   : > { %v2278_v36 = vpop.eup %2277  ;;  %2293 = vpow2.f32 %v1282_v8  ;;  %v1088_v51 = vmul.f32 1.442695, %v3723_v2 }
 0x3e2   : > { %v2280_v39 = vpop.eup %2279  ;;  %1304 = vadd.xlane.f32.xlu1 %v1303_v61  ;;  %v1327_v58 = vadd.f32 %v2278_v36, %v2276_v32  ;;  %2295 = vpow2.f32 %v1064_v7  ;;  %v1042_v32 = vld [vmem:[#allocation5 + $0x50] sm:$0xff]  ;;  %v3724_v61 = vld [vmem:[#allocation28_spill] sm:$0xff]  ;;  %v3725_v36 = vld [vmem:[#allocation30_spill] sm:$0xff] }
 0x3e3   : > { %v2282_v37 = vpop.eup %2281  ;;  %2297 = vpow2.f32 %v1080_v23 }
 0x3e4   : > { %v1306_v47 = vadd.f32 %v2282_v37, %v2280_v39  ;;  %2299 = vpow2.f32 %v1082_v11  ;;  %v3726_v39 = vsub.f32 %v3724_v61, %v3725_v36 }
 0x3e5   : > { %2301 = vpow2.f32 %v1066_v13  ;;  %v1043_v13 = vld [vmem:[#allocation5 + $0x58] sm:$0xff] }
 0x3e6   : > { %v2284_v50 = vpop.eup %2283  ;;  %1307 = vadd.xlane.f32.xlu0 %v1306_v47  ;;  %1328 = vadd.xlane.f32.xlu1 %v1327_v58  ;;  %2303 = vpow2.f32 %v1068_v62  ;;  %v1074_v37 = vmul.f32 1.442695, %v3726_v39 }
 0x3e7   : > { %v2286_v3 = vpop.eup %2285  ;;  %2305 = vpow2.f32 %v1084_v20 }
 0x3e8   : > { %v2288_v9 = vpop.eup %2287  ;;  %v1309_v6 = vadd.f32 %v2286_v3, %v2284_v50  ;;  %2307 = vpow2.f32 %v1070_v29  ;;  %v1035_v3 = vld [vmem:[#allocation5 + $0x18] sm:$0xff]  ;;  %v3736_v29 = vld [vmem:[#allocation37_spill] sm:$0xff] }
 0x3e9   : > { %v2290_v10 = vpop.eup %2289  ;;  %2309 = vpow2.f32 %v1086_v43  ;;  %v3740_v43 = vld [vmem:[#allocation41_spill] sm:$0xff] }
 0x3ea   : > { %v2292_v34 = vpop.eup %2291  ;;  %1310 = vadd.xlane.f32.xlu1 %v1309_v6  ;;  %v1333_v35 = vadd.f32 %v2290_v10, %v2288_v9  ;;  %2311 = vpow2.f32 %v1072_v40  ;;  %v3727_v9 = vld [vmem:[#allocation32_spill] sm:$0xff]  ;;  %v3728_v6 = vld [vmem:[#allocation34_spill] sm:$0xff] }
 0x3eb   : > { %v2294_v38 = vpop.eup %2293  ;;  %2313 = vpow2.f32 %v1088_v51  ;;  %v3729_v10 = vsub.f32 %v3727_v9, %v3728_v6  ;;  %v1037_v40 = vld [vmem:[#allocation5 + $0x28] sm:$0xff] }
 0x3ec   : > { %v1330_v18 = vadd.f32 %v2294_v38, %v2292_v34  ;;  %v2296_v52 = vpop.eup %2295  ;;  %2315 = vpow2.f32 %v1074_v37 }
 0x3ed   : > { %v2298_v0 = vpop.eup %2297  ;;  %v1096_v5 = vmul.f32 %v2296_v52, %v1032_v14  ;;  %v1090_v34 = vmul.f32 1.442695, %v3729_v10  ;;  %v3733_v52 = vld [vmem:[#allocation36_spill] sm:$0xff]  ;;  %v3734_v14 = vld [vmem:[#allocation38_spill] sm:$0xff] }
 0x3ee   : > { %1331 = vadd.xlane.f32.xlu0 %v1330_v18  ;;  %1334 = vadd.xlane.f32.xlu1 %v1333_v35  ;;  %v2300_v42 = vpop.eup %2299  ;;  %v1104_v26 = vmul.f32 %v2298_v0, %v1040_v17  ;;  %v3730_v18 = vld [vmem:[#allocation33_spill] sm:$0xff]  ;;  %v3731_v35 = vld [vmem:[#allocation35_spill] sm:$0xff]  ;;  %v3735_v4 = vsub.f32 %v3733_v52, %v3734_v14 }
 0x3ef   : > { %v2302_v53 = vpop.eup %2301  ;;  %v1105_v56 = vmul.f32 %v2300_v42, %v1041_v21  ;;  %v3732_v45 = vsub.f32 %v3730_v18, %v3731_v35  ;;  %2317 = vpow2.f32 %v1090_v34  ;;  %v1391_v14 = vld [vmem:[#allocation4 + $0x10] sm:$0xff] (!%p1936_p3) }
 0x3f0   : > { %v1097_v1 = vmul.f32 %v2302_v53, %v1033_v57  ;;  %v2304_v15 = vpop.eup %2303  ;;  %v1078_v20 = vmul.f32 1.442695, %v3735_v4 }
 0x3f1   : > { %v1098_v49 = vmul.f32 %v2304_v15, %v1034_v48  ;;  %v2306_v8 = vpop.eup %2305  ;;  %v1076_v7 = vmul.f32 1.442695, %v3732_v45  ;;  %v1045_v48 = vld [vmem:[#allocation5 + $0x68] sm:$0xff]  ;;  %v2592_v45 = vmov (!%p1936_p3), 0  }
 0x3f2   : > { %v2308_v58 = vpop.eup %2307  ;;  %v1106_v50 = vmul.f32 %v2306_v8, %v1042_v32  ;;  %2328 = vset.pattern.permute.xlu1 (!%p1936_p3), %v2592_v45  ;;  %2327 = vset.pattern.permute.xlu0 (!%p1936_p3), %v2592_v45 }
 0x3f3   : > { %v2310_v23 = vpop.eup %2309  ;;  %v1099_v12 = vmul.f32 %v2308_v58, %v1035_v3  ;;  %2319 = vpow2.f32 %v1076_v7  ;;  %v1047_v58 = vld [vmem:[#allocation5 + $0x78] sm:$0xff] }
 0x3f4   : > { %v2312_v11 = vpop.eup %2311  ;;  %v1107_v0 = vmul.f32 %v2310_v23, %v1043_v13  ;;  %2321 = vpow2.f32 %v1078_v20 }
 0x3f5   : > { %v2314_v17 = vpop.eup %2313 }
 0x3f6   : > { %v1108_v57 = vmul.f32 %v2314_v17, %v1044_v22  ;;  %v2316_v27 = vpop.eup %2315 }
 0x44f   : > { %v1290_v41 = vpop.xlane.xlu1 %1289 }
 0x450   : > { %v1336_v33 = vadd.f32 %v1290_v41, %v1096_v5  ;;  %v1100_v5 = vmul.f32 %v2312_v11, %v1036_v46 }
 0x452   : > { %1353 = vst.msk [vmem:[#allocation5] sm:$0xff] %vm1352_vm3, %v1336_v33  ;;  %v3737_v33 = vld [vmem:[#allocation39_spill] sm:$0xff] }
 0x453   : > { %v1314_v44 = vpop.xlane.xlu0 %1313  ;;  %v3738_v21 = vsub.f32 %v3736_v29, %v3737_v33 }
 0x454   : > { %v1344_v54 = vadd.f32 %v1314_v44, %v1104_v26 }
 0x455   : > { %v1317_v59 = vpop.xlane.xlu1 %1316  ;;  %v1092_v26 = vmul.f32 1.442695, %v3738_v21 }
 0x456   : > { %v1345_v28 = vadd.f32 %v1317_v59, %v1105_v56  ;;  %1361 = vst.msk [vmem:[#allocation5 + $0x40] sm:$0xff] %vm1352_vm3, %v1344_v54  ;;  %v3741_v56 = vsub.f32 %v3739_v31, %v3740_v43 }
 0x457   : > { %v1293_v60 = vpop.xlane.xlu0 %1292  ;;  %2323 = vpow2.f32 %v1092_v26  ;;  %v1390_v26 = vld [vmem:[#allocation4 + $0x8] sm:$0xff] (!%p1936_p3) }
 0x458   : > { %1362 = vst.msk [vmem:[#allocation5 + $0x48] sm:$0xff] %vm1352_vm3, %v1345_v28  ;;  %v1337_v55 = vadd.f32 %v1293_v60, %v1097_v1  ;;  %v1094_v54 = vmul.f32 1.442695, %v3741_v56  ;;  %v2318_v28 = vpop.eup %2317  ;;  %v1101_v1 = vmul.f32 %v2316_v27, %v1037_v40  ;;  %v1394_v40 = vld [vmem:[#allocation4 + $0x28] sm:$0xff] (!%p1936_p3) }
 0x459   : > { %v2320_v15 = vpop.eup %2319  ;;  %v1109_v2 = vmul.f32 %v2318_v28, %v1045_v48  ;;  %v1405_v7 = vld [vmem:[#allocation5] sm:$0xff] (!%p1936_p3) }
 0x45a   : > { %1354 = vst.msk [vmem:[#allocation5 + $0x8] sm:$0xff] %vm1352_vm3, %v1337_v55  ;;  %2325 = vpow2.f32 %v1094_v54  ;;  %v1102_v51 = vmul.f32 %v2320_v15, %v1038_v63  ;;  %v2322_v55 = vpop.eup %2321  ;;  %v1393_v15 = vld [vmem:[#allocation4 + $0x20] sm:$0xff] (!%p1936_p3) }
 0x45b   : > { %v1296_v25 = vpop.xlane.xlu0 %1295 }
 0x45c   : > { %v1338_v47 = vadd.f32 %v1296_v25, %v1098_v49  ;;  %v1039_v25 = vld [vmem:[#allocation5 + $0x38] sm:$0xff] }
 0x45d   : > { %v1103_v39 = vmul.f32 %v2322_v55, %v1039_v25  ;;  %v1395_v25 = vld [vmem:[#allocation4 + $0x30] sm:$0xff] (!%p1936_p3) }
 0x45e   : > { %1355 = vst.msk [vmem:[#allocation5 + $0x10] sm:$0xff] %vm1352_vm3, %v1338_v47 }
 0x45f   : > { %v1320_v38 = vpop.xlane.xlu0 %1319  ;;  %v1414_v46 = vld [vmem:[#allocation5 + $0x48] sm:$0xff] (!%p1936_p3) }
 0x460   : > { %v1346_v19 = vadd.f32 %v1320_v38, %v1106_v50  ;;  %v1046_v50 = vld [vmem:[#allocation5 + $0x70] sm:$0xff] }
 0x461   : > { %v2324_v36 = vpop.eup %2323  ;;  %v1406_v23 = vld [vmem:[#allocation5 + $0x8] sm:$0xff] (!%p1936_p3) }
 0x462   : > { %1363 = vst.msk [vmem:[#allocation5 + $0x50] sm:$0xff] %vm1352_vm3, %v1346_v19  ;;  %v1110_v6 = vmul.f32 %v2324_v36, %v1046_v50  ;;  %v1397_v50 = vld [vmem:[#allocation4 + $0x40] sm:$0xff] (!%p1936_p3) }
 0x463   : > { %v1299_v16 = vpop.xlane.xlu1 %1298 }
 0x464   : > { %v1339_v62 = vadd.f32 %v1299_v16, %v1099_v12  ;;  %v2326_v37 = vpop.eup %2325 }
 0x465   : > { %v1111_v9 = vmul.f32 %v2326_v37, %v1047_v58  ;;  %v1407_v35 = vld [vmem:[#allocation5 + $0x10] sm:$0xff] (!%p1936_p3)  ;;  %v1398_v37 = vld [vmem:[#allocation4 + $0x48] sm:$0xff] (!%p1936_p3) }
 0x466   : > { %1356 = vst.msk [vmem:[#allocation5 + $0x18] sm:$0xff] %vm1352_vm3, %v1339_v62  ;;  %2329 = vlog2.f32 (!%p1936_p3), %v1407_v35  ;;  %v1413_v62 = vld [vmem:[#allocation5 + $0x40] sm:$0xff] (!%p1936_p3)  ;;  %v1399_v35 = vld [vmem:[#allocation4 + $0x50] sm:$0xff] (!%p1936_p3) }
 0x467   : > { %v1323_v41 = vpop.xlane.xlu1 %1322  ;;  %v1302_v42 = vpop.xlane.xlu0 %1301  ;;  %2331 = vlog2.f32 (!%p1936_p3), %v1405_v7 }
 0x468   : > { %v1347_v44 = vadd.f32 %v1323_v41, %v1107_v0  ;;  %v1340_v53 = vadd.f32 %v1302_v42, %v1100_v5  ;;  %v1389_v0 = vld [vmem:[#allocation4] sm:$0xff] (!%p1936_p3)  ;;  %v1392_v42 = vld [vmem:[#allocation4 + $0x18] sm:$0xff] (!%p1936_p3) }
 0x469   : > { %v1415_v22 = vld [vmem:[#allocation5 + $0x50] sm:$0xff] (!%p1936_p3) }
 0x46a   : > { %1364 = vst.msk [vmem:[#allocation5 + $0x58] sm:$0xff] %vm1352_vm3, %v1347_v44  ;;  %1357 = vst.msk [vmem:[#allocation5 + $0x20] sm:$0xff] %vm1352_vm3, %v1340_v53 }
 0x46b   : > { %v1326_v30 = vpop.xlane.xlu0 %1325 }
 0x46c   : > { %v1348_v59 = vadd.f32 %v1326_v30, %v1108_v57 }
 0x46d   : > { %v1408_v19 = vld [vmem:[#allocation5 + $0x18] sm:$0xff] (!%p1936_p3) }
 0x46e   : > { %1365 = vst.msk [vmem:[#allocation5 + $0x60] sm:$0xff] %vm1352_vm3, %v1348_v59  ;;  %2333 = vlog2.f32 (!%p1936_p3), %v1408_v19 }
 0x46f   : > { %v1305_v60 = vpop.xlane.xlu1 %1304  ;;  %2335 = vlog2.f32 (!%p1936_p3), %v1406_v23 }
 0x470   : > { %v1341_v24 = vadd.f32 %v1305_v60, %v1101_v1  ;;  %v2330_v52 = vpop.eup (!%p1936_p3), %2329 }
 0x471   : > { %v1409_v11 = vld [vmem:[#allocation5 + $0x20] sm:$0xff] (!%p1936_p3)  ;;  %v2332_v4 = vpop.eup (!%p1936_p3), %2331  ;;  %v1426_v20 = vmul.f32 (!%p1936_p3), 0.6931472, %v2330_v52  ;;  %v1416_v5 = vld [vmem:[#allocation5 + $0x58] sm:$0xff] (!%p1936_p3) }
 0x472   : > { %1358 = vst.msk [vmem:[#allocation5 + $0x28] sm:$0xff] %vm1352_vm3, %v1341_v24  ;;  %v1422_v41 = vmul.f32 (!%p1936_p3), 0.6931472, %v2332_v4 }
 0x473   : > { %v1329_v49 = vpop.xlane.xlu1 %1328  ;;  %v1308_v8 = vpop.xlane.xlu0 %1307  ;;  %v1455_v33 = vadd.f32 (!%p1936_p3), %v1426_v20, %v1391_v14  ;;  %v1404_v14 = vld [vmem:[#allocation4 + $0x78] sm:$0xff] (!%p1936_p3)  ;;  %v1403_v20 = vld [vmem:[#allocation4 + $0x70] sm:$0xff] (!%p1936_p3) }
 0x474   : > { %v1349_v32 = vadd.f32 %v1329_v49, %v1109_v2  ;;  %v1342_v61 = vadd.f32 %v1308_v8, %v1102_v51  ;;  %v1453_v53 = vadd.f32 (!%p1936_p3), %v1422_v41, %v1389_v0  ;;  %v1396_v51 = vld [vmem:[#allocation4 + $0x38] sm:$0xff] (!%p1936_p3)  ;;  %v1474_v41 = vld [vmem:[#allocation3 + $0x28] sm:$0xff] (!%p1936_p3) }
 0x475   : > { %1513 = vperm.xlu1 (!%p1936_p3), %2328, %v1455_v33   ;;  %v1417_v28 = vld [vmem:[#allocation5 + $0x60] sm:$0xff] (!%p1936_p3)  ;;  %v1470_v33 = vld [vmem:[#allocation3 + $0x8] sm:$0xff] (!%p1936_p3) }
 0x476   : > { %1366 = vst.msk [vmem:[#allocation5 + $0x68] sm:$0xff] %vm1352_vm3, %v1349_v32  ;;  %1359 = vst.msk [vmem:[#allocation5 + $0x30] sm:$0xff] %vm1352_vm3, %v1342_v61  ;;  %1503 = vperm.xlu0 (!%p1936_p3), %2327, %v1453_v53  }
 0x477   : > { %v1311_v47 = vpop.xlane.xlu1 %1310 }
 0x478   : > { %v1343_v3 = vadd.f32 %v1311_v47, %v1103_v39  ;;  %1388 = sbr.rel (%p1936_p3) target bundleno = 1319 (0x527), region = 60  ;;  %v2334_v17 = vpop.eup (!%p1936_p3), %2333 }
 0x479   : > { %v1410_v12 = vld [vmem:[#allocation5 + $0x28] sm:$0xff] (!%p1936_p3)  ;;  %v2336_v29 = vpop.eup (!%p1936_p3), %2335  ;;  %v1428_v21 = vmul.f32 (!%p1936_p3), 0.6931472, %v2334_v17  ;;  %v1473_v17 = vld [vmem:[#allocation3 + $0x20] sm:$0xff] (!%p1936_p3) }
 0x47a   : > { %1360 = vst.msk [vmem:[#allocation5 + $0x38] sm:$0xff] %vm1352_vm3, %v1343_v3  ;;  %2337 = vlog2.f32 (!%p1936_p3), %v1410_v12  ;;  %v1424_v31 = vmul.f32 (!%p1936_p3), 0.6931472, %v2336_v29  ;;  %v1402_v12 = vld [vmem:[#allocation4 + $0x68] sm:$0xff] (!%p1936_p3)  ;;  %v1469_v29 = vld [vmem:[#allocation3] sm:$0xff] (!%p1936_p3) }
 0x47b   : > { %v1335_v10 = vpop.xlane.xlu1 %1334  ;;  %v1332_v34 = vpop.xlane.xlu0 %1331  ;;  %2339 = vlog2.f32 (!%p1936_p3), %v1409_v11  ;;  %v1456_v56 = vadd.f32 (!%p1936_p3), %v1428_v21, %v1392_v42  ;;  %v1650_v42 = vld [vmem:[#allocation3 + $0x120] sm:$0xff] (!%p1936_p3) }
 0x47c   : > { %v1351_v38 = vadd.f32 %v1335_v10, %v1111_v9  ;;  %v1350_v18 = vadd.f32 %v1332_v34, %v1110_v6  ;;  %v1454_v30 = vadd.f32 (!%p1936_p3), %v1424_v31, %v1390_v26  ;;  %v1400_v34 = vld [vmem:[#allocation4 + $0x58] sm:$0xff] (!%p1936_p3)  ;;  %v1646_v21 = vld [vmem:[#allocation3 + $0x100] sm:$0xff] (!%p1936_p3)  ;;  %v1647_v26 = vld [vmem:[#allocation3 + $0x108] sm:$0xff] (!%p1936_p3) }
 0x47d   : > { %v1411_v13 = vld [vmem:[#allocation5 + $0x30] sm:$0xff] (!%p1936_p3)  ;;  %v1418_v57 = vld [vmem:[#allocation5 + $0x68] sm:$0xff] (!%p1936_p3)  ;;  %1518 = vperm.xlu1 (!%p1936_p3), %2328, %v1456_v56  }
 0x47e   : > { %1368 = vst.msk [vmem:[#allocation5 + $0x78] sm:$0xff] %vm1352_vm3, %v1351_v38  ;;  %1367 = vst.msk [vmem:[#allocation5 + $0x70] sm:$0xff] %vm1352_vm3, %v1350_v18  ;;  %1508 = vperm.xlu0 (!%p1936_p3), %2327, %v1454_v30  }
 0x481   : > { %v1412_v16 = vld [vmem:[#allocation5 + $0x38] sm:$0xff] }
 0x482   : > { %2341 = vlog2.f32 %v1412_v16 }
 0x483   : > { %2343 = vlog2.f32 %v1411_v13  ;;  %v1401_v13 = vld [vmem:[#allocation4 + $0x60] sm:$0xff] }
 0x484   : > { %2345 = vlog2.f32 %v1414_v46  ;;  %v2338_v44 = vpop.eup %2337 }
 0x485   : > { %2347 = vlog2.f32 %v1413_v62  ;;  %v2340_v43 = vpop.eup %2339  ;;  %v1432_v54 = vmul.f32 0.6931472, %v2338_v44  ;;  %v1420_v63 = vld [vmem:[#allocation5 + $0x78] sm:$0xff]  ;;  %v1419_v49 = vld [vmem:[#allocation5 + $0x70] sm:$0xff] }
 0x486   : > { %2349 = vlog2.f32 %v1416_v5  ;;  %v1430_v59 = vmul.f32 0.6931472, %v2340_v43 }
 0x487   : > { %2351 = vlog2.f32 %v1415_v22  ;;  %v1458_v60 = vadd.f32 %v1432_v54, %v1394_v40  ;;  %v1651_v22 = vld [vmem:[#allocation3 + $0x128] sm:$0xff] }
 0x488   : > { %2353 = vlog2.f32 %v1418_v57  ;;  %v1457_v2 = vadd.f32 %v1430_v59, %v1393_v15  ;;  %v1475_v57 = vld [vmem:[#allocation3 + $0x30] sm:$0xff]  ;;  %v1653_v15 = vld [vmem:[#allocation3 + $0x138] sm:$0xff] }
 0x489   : > { %2355 = vlog2.f32 %v1417_v28  ;;  %1528 = vperm.xlu1 %2328, %v1458_v60   ;;  %v1471_v60 = vld [vmem:[#allocation3 + $0x10] sm:$0xff] }
 0x48a   : > { %2357 = vlog2.f32 %v1420_v63  ;;  %1523 = vperm.xlu0 %2327, %v1457_v2   ;;  %v1648_v63 = vld [vmem:[#allocation3 + $0x110] sm:$0xff] }
 0x48b   : > { %2359 = vlog2.f32 %v1419_v49 }
 0x48c   : > { %v2342_v27 = vpop.eup %2341 }
 0x48d   : > { %v2344_v1 = vpop.eup %2343  ;;  %v1436_v48 = vmul.f32 0.6931472, %v2342_v27  ;;  %v1476_v27 = vld [vmem:[#allocation3 + $0x38] sm:$0xff] }
 0x48e   : > { %v2346_v24 = vpop.eup %2345  ;;  %v1434_v55 = vmul.f32 0.6931472, %v2344_v1  ;;  %v1652_v1 = vld [vmem:[#allocation3 + $0x130] sm:$0xff] }
 0x48f   : > { %v2348_v8 = vpop.eup %2347  ;;  %v1460_v32 = vadd.f32 %v1436_v48, %v1396_v51  ;;  %v1440_v61 = vmul.f32 0.6931472, %v2346_v24  ;;  %v1472_v48 = vld [vmem:[#allocation3 + $0x18] sm:$0xff] }
 0x490   : > { %v2350_v36 = vpop.eup %2349  ;;  %v1459_v39 = vadd.f32 %v1434_v55, %v1395_v25  ;;  %v1438_v47 = vmul.f32 0.6931472, %v2348_v8  ;;  %v1649_v24 = vld [vmem:[#allocation3 + $0x118] sm:$0xff] }
 0x491   : > { %v2352_v58 = vpop.eup %2351  ;;  %1538 = vperm.xlu1 %2328, %v1460_v32   ;;  %v1462_v3 = vadd.f32 %v1440_v61, %v1398_v37  ;;  %v1444_v9 = vmul.f32 0.6931472, %v2350_v36  ;;  %v1479_v32 = vld [vmem:[#allocation3 + $0x50] sm:$0xff]  ;;  %v1480_v61 = vld [vmem:[#allocation3 + $0x58] sm:$0xff] }
 0x492   : > { %v2354_v6 = vpop.eup %2353  ;;  %1533 = vperm.xlu0 %2327, %v1459_v39   ;;  %v1461_v10 = vadd.f32 %v1438_v47, %v1397_v50  ;;  %v1442_v38 = vmul.f32 0.6931472, %v2352_v58  ;;  %v1656_v58 = vld [vmem:[#allocation3 + $0x150] sm:$0xff]  ;;  %v1657_v50 = vld [vmem:[#allocation3 + $0x158] sm:$0xff] }
 0x493   : > { %v2356_v18 = vpop.eup %2355  ;;  %v1464_v45 = vadd.f32 %v1444_v9, %v1400_v34  ;;  %v1448_v7 = vmul.f32 0.6931472, %v2354_v6  ;;  %v1478_v9 = vld [vmem:[#allocation3 + $0x48] sm:$0xff]  ;;  %v1654_v6 = vld [vmem:[#allocation3 + $0x140] sm:$0xff] }
 0x494   : > { %v2358_v19 = vpop.eup %2357  ;;  %v1463_v23 = vadd.f32 %v1442_v38, %v1399_v35  ;;  %v1446_v11 = vmul.f32 0.6931472, %v2356_v18 }
 0x495   : > { %1548 = vperm.xlu1 %2328, %v1462_v3   ;;  %v2360_v16 = vpop.eup %2359  ;;  %v1466_v46 = vadd.f32 %v1448_v7, %v1402_v12  ;;  %v1452_v62 = vmul.f32 0.6931472, %v2358_v19  ;;  %v1477_v3 = vld [vmem:[#allocation3 + $0x40] sm:$0xff]  ;;  %v1483_v19 = vld [vmem:[#allocation3 + $0x70] sm:$0xff] }
 0x496   : > { %1543 = vperm.xlu0 %2327, %v1461_v10   ;;  %v1465_v52 = vadd.f32 %v1446_v11, %v1401_v13  ;;  %v1450_v4 = vmul.f32 0.6931472, %v2360_v16  ;;  %v1655_v10 = vld [vmem:[#allocation3 + $0x148] sm:$0xff] }
 0x497   : > { %v1468_v0 = vadd.f32 %v1452_v62, %v1404_v14  ;;  %v1661_v62 = vld [vmem:[#allocation3 + $0x178] sm:$0xff]  ;;  %v1482_v14 = vld [vmem:[#allocation3 + $0x68] sm:$0xff] }
 0x498   : > { %v1467_v5 = vadd.f32 %v1450_v4, %v1403_v20  ;;  %v1658_v4 = vld [vmem:[#allocation3 + $0x160] sm:$0xff]  ;;  %v1659_v20 = vld [vmem:[#allocation3 + $0x168] sm:$0xff] }
 0x499   : > { %1558 = vperm.xlu1 %2328, %v1464_v45  }
 0x49a   : > { %1553 = vperm.xlu0 %2327, %v1463_v23   ;;  %v1484_v23 = vld [vmem:[#allocation3 + $0x78] sm:$0xff] }
 0x49d   : > { %1568 = vperm.xlu1 %2328, %v1466_v46   ;;  %v1660_v46 = vld [vmem:[#allocation3 + $0x170] sm:$0xff] }
 0x49e   : > { %1563 = vperm.xlu0 %2327, %v1465_v52   ;;  %v1481_v52 = vld [vmem:[#allocation3 + $0x60] sm:$0xff] }
 0x4a1   : > { %1578 = vperm.xlu1 %2328, %v1468_v0  }
 0x4a2   : > { %1573 = vperm.xlu0 %2327, %v1467_v5  }
 0x4f4   : > { %v1514_v44 = vpop.permute.xlu1 %1513 }
 0x4f5   : > { %v1585_v53 = vsub.f32 %v1473_v17, %v1514_v44  ;;  %v1586_v31 = vsub.f32 %v1474_v41, %v1514_v44  ;;  %v1682_v43 = vsub.f32 %v1650_v42, %v1514_v44  ;;  %v1683_v56 = vsub.f32 %v1651_v22, %v1514_v44  ;;  %v1504_v54 = vpop.permute.xlu0 %1503 }
 0x4f6   : > { %v1581_v30 = vsub.f32 %v1469_v29, %v1504_v54  ;;  %v1582_v40 = vsub.f32 %v1470_v33, %v1504_v54  ;;  %v1678_v59 = vsub.f32 %v1646_v21, %v1504_v54  ;;  %v1679_v28 = vsub.f32 %v1647_v26, %v1504_v54  ;;  %v1487_v29 = vld [vmem:[#allocation3 + $0x90] sm:$0xff]  ;;  %v1488_v33 = vld [vmem:[#allocation3 + $0x98] sm:$0xff]  ;;  %v1486_v54 = vld [vmem:[#allocation3 + $0x88] sm:$0xff] }
 0x4f7   : > { %1617 = vst [vmem:[%s2918_s30 + $0x40] sm:$0xff] %v1585_v53  ;;  %1618 = vst [vmem:[%s2918_s30 + $0x48] sm:$0xff] %v1586_v31  ;;  %v1664_v31 = vld [vmem:[#allocation3 + $0x190] sm:$0xff] }
 0x4f8   : > { %1714 = vst [vmem:[%s2918_s30 + $0x50] sm:$0xff] %v1682_v43  ;;  %1715 = vst [vmem:[%s2918_s30 + $0x58] sm:$0xff] %v1683_v56  ;;  %v1665_v43 = vld [vmem:[#allocation3 + $0x198] sm:$0xff]  ;;  %v1485_v56 = vld [vmem:[#allocation3 + $0x80] sm:$0xff] }
 0x4f9   : > { %1613 = vst [vmem:[%s2918_s30] sm:$0xff] %v1581_v30  ;;  %1614 = vst [vmem:[%s2918_s30 + $0x8] sm:$0xff] %v1582_v40 }
 0x4fa   : > { %1710 = vst [vmem:[%s2918_s30 + $0x10] sm:$0xff] %v1678_v59  ;;  %1711 = vst [vmem:[%s2918_s30 + $0x18] sm:$0xff] %v1679_v28 }
 0x4fc   : > { %v1519_v2 = vpop.permute.xlu1 %1518 }
 0x4fd   : > { %v1587_v51 = vsub.f32 %v1475_v57, %v1519_v2  ;;  %v1588_v55 = vsub.f32 %v1476_v27, %v1519_v2  ;;  %v1684_v49 = vsub.f32 %v1652_v1, %v1519_v2  ;;  %v1685_v8 = vsub.f32 %v1653_v15, %v1519_v2  ;;  %v1509_v25 = vpop.permute.xlu0 %1508  ;;  %v1662_v57 = vld [vmem:[#allocation3 + $0x180] sm:$0xff]  ;;  %v1663_v27 = vld [vmem:[#allocation3 + $0x188] sm:$0xff] }
 0x4fe   : > { %v1583_v36 = vsub.f32 %v1471_v60, %v1509_v25  ;;  %v1584_v39 = vsub.f32 %v1472_v48, %v1509_v25  ;;  %v1680_v37 = vsub.f32 %v1648_v63, %v1509_v25  ;;  %v1681_v47 = vsub.f32 %v1649_v24, %v1509_v25  ;;  %v1491_v60 = vld [vmem:[#allocation3 + $0xb0] sm:$0xff]  ;;  %v1492_v48 = vld [vmem:[#allocation3 + $0xb8] sm:$0xff]  ;;  %v1490_v25 = vld [vmem:[#allocation3 + $0xa8] sm:$0xff] }
 0x4ff   : > { %1619 = vst [vmem:[%s2918_s30 + $0x60] sm:$0xff] %v1587_v51  ;;  %1620 = vst [vmem:[%s2918_s30 + $0x68] sm:$0xff] %v1588_v55  ;;  %v1668_v55 = vld [vmem:[#allocation3 + $0x1b0] sm:$0xff] }
 0x500   : > { %1716 = vst [vmem:[%s2918_s30 + $0x70] sm:$0xff] %v1684_v49  ;;  %1717 = vst [vmem:[%s2918_s30 + $0x78] sm:$0xff] %v1685_v8  ;;  %v1669_v49 = vld [vmem:[#allocation3 + $0x1b8] sm:$0xff]  ;;  %v1489_v8 = vld [vmem:[#allocation3 + $0xa0] sm:$0xff] }
 0x501   : > { %1615 = vst [vmem:[%s2918_s30 + $0x20] sm:$0xff] %v1583_v36  ;;  %1616 = vst [vmem:[%s2918_s30 + $0x28] sm:$0xff] %v1584_v39 }
 0x502   : > { %1712 = vst [vmem:[%s2918_s30 + $0x30] sm:$0xff] %v1680_v37  ;;  %1713 = vst [vmem:[%s2918_s30 + $0x38] sm:$0xff] %v1681_v47 }
 0x508   : > { %v1529_v34 = vpop.permute.xlu1 %1528 }
 0x509   : > { %v1591_v38 = vsub.f32 %v1479_v32, %v1529_v34  ;;  %v1592_v18 = vsub.f32 %v1480_v61, %v1529_v34  ;;  %v1688_v35 = vsub.f32 %v1656_v58, %v1529_v34  ;;  %v1689_v45 = vsub.f32 %v1657_v50, %v1529_v34  ;;  %v1524_v7 = vpop.permute.xlu0 %1523  ;;  %v1666_v32 = vld [vmem:[#allocation3 + $0x1a0] sm:$0xff]  ;;  %v1667_v61 = vld [vmem:[#allocation3 + $0x1a8] sm:$0xff] }
 0x50a   : > { %v1589_v12 = vsub.f32 %v1477_v3, %v1524_v7  ;;  %v1590_v11 = vsub.f32 %v1478_v9, %v1524_v7  ;;  %v1686_v16 = vsub.f32 %v1654_v6, %v1524_v7  ;;  %v1687_v13 = vsub.f32 %v1655_v10, %v1524_v7  ;;  %v1495_v3 = vld [vmem:[#allocation3 + $0xd0] sm:$0xff]  ;;  %v1496_v9 = vld [vmem:[#allocation3 + $0xd8] sm:$0xff]  ;;  %v1494_v7 = vld [vmem:[#allocation3 + $0xc8] sm:$0xff] }
 0x50b   : > { %1623 = vst [vmem:[%s2918_s30 + $0xa0] sm:$0xff] %v1591_v38  ;;  %1624 = vst [vmem:[%s2918_s30 + $0xa8] sm:$0xff] %v1592_v18  ;;  %v1672_v18 = vld [vmem:[#allocation3 + $0x1d0] sm:$0xff] }
 0x50c   : > { %1720 = vst [vmem:[%s2918_s30 + $0xb0] sm:$0xff] %v1688_v35  ;;  %1721 = vst [vmem:[%s2918_s30 + $0xb8] sm:$0xff] %v1689_v45  ;;  %v1673_v35 = vld [vmem:[#allocation3 + $0x1d8] sm:$0xff]  ;;  %v1493_v45 = vld [vmem:[#allocation3 + $0xc0] sm:$0xff] }
 0x50d   : > { %1621 = vst [vmem:[%s2918_s30 + $0x80] sm:$0xff] %v1589_v12  ;;  %1622 = vst [vmem:[%s2918_s30 + $0x88] sm:$0xff] %v1590_v11 }
 0x50e   : > { %1718 = vst [vmem:[%s2918_s30 + $0x90] sm:$0xff] %v1686_v16  ;;  %1719 = vst [vmem:[%s2918_s30 + $0x98] sm:$0xff] %v1687_v13 }
 0x510   : > { %v1539_v0 = vpop.permute.xlu1 %1538 }
 0x511   : > { %v1595_v5 = vsub.f32 %v1483_v19, %v1539_v0  ;;  %v1596_v17 = vsub.f32 %v1484_v23, %v1539_v0  ;;  %v1692_v41 = vsub.f32 %v1660_v46, %v1539_v0  ;;  %v1693_v42 = vsub.f32 %v1661_v62, %v1539_v0  ;;  %v1534_v22 = vpop.permute.xlu0 %1533  ;;  %v1670_v19 = vld [vmem:[#allocation3 + $0x1c0] sm:$0xff]  ;;  %v1671_v23 = vld [vmem:[#allocation3 + $0x1c8] sm:$0xff] }
 0x512   : > { %v1593_v21 = vsub.f32 %v1481_v52, %v1534_v22  ;;  %v1594_v26 = vsub.f32 %v1482_v14, %v1534_v22  ;;  %v1690_v44 = vsub.f32 %v1658_v4, %v1534_v22  ;;  %v1691_v53 = vsub.f32 %v1659_v20, %v1534_v22  ;;  %v1499_v52 = vld [vmem:[#allocation3 + $0xf0] sm:$0xff]  ;;  %v1500_v14 = vld [vmem:[#allocation3 + $0xf8] sm:$0xff]  ;;  %v1498_v22 = vld [vmem:[#allocation3 + $0xe8] sm:$0xff] }
 0x513   : > { %1627 = vst [vmem:[%s2918_s30 + $0xe0] sm:$0xff] %v1595_v5  ;;  %1628 = vst [vmem:[%s2918_s30 + $0xe8] sm:$0xff] %v1596_v17  ;;  %v1676_v17 = vld [vmem:[#allocation3 + $0x1f0] sm:$0xff] }
 0x514   : > { %1724 = vst [vmem:[%s2918_s30 + $0xf0] sm:$0xff] %v1692_v41  ;;  %1725 = vst [vmem:[%s2918_s30 + $0xf8] sm:$0xff] %v1693_v42  ;;  %v1549_v30 = vpop.permute.xlu1 %1548  ;;  %v1677_v41 = vld [vmem:[#allocation3 + $0x1f8] sm:$0xff]  ;;  %v1497_v42 = vld [vmem:[#allocation3 + $0xe0] sm:$0xff] }
 0x515   : > { %1625 = vst [vmem:[%s2918_s30 + $0xc0] sm:$0xff] %v1593_v21  ;;  %1626 = vst [vmem:[%s2918_s30 + $0xc8] sm:$0xff] %v1594_v26  ;;  %v1599_v40 = vsub.f32 %v1487_v29, %v1549_v30  ;;  %v1600_v59 = vsub.f32 %v1488_v33, %v1549_v30  ;;  %v1696_v28 = vsub.f32 %v1664_v31, %v1549_v30  ;;  %v1544_v15 = vpop.permute.xlu0 %1543  ;;  %v1674_v29 = vld [vmem:[#allocation3 + $0x1e0] sm:$0xff]  ;;  %v1675_v33 = vld [vmem:[#allocation3 + $0x1e8] sm:$0xff] }
 0x516   : > { %1722 = vst [vmem:[%s2918_s30 + $0xd0] sm:$0xff] %v1690_v44  ;;  %1723 = vst [vmem:[%s2918_s30 + $0xd8] sm:$0xff] %v1691_v53  ;;  %v1697_v1 = vsub.f32 %v1665_v43, %v1549_v30  ;;  %v1597_v63 = vsub.f32 %v1485_v56, %v1544_v15  ;;  %v1598_v24 = vsub.f32 %v1486_v54, %v1544_v15 }
 0x517   : > { %v1694_v2 = vsub.f32 %v1662_v57, %v1544_v15  ;;  %v1695_v51 = vsub.f32 %v1663_v27, %v1544_v15  ;;  %1631 = vst [vmem:[%s2918_s30 + $0x120] sm:$0xff] %v1599_v40  ;;  %1632 = vst [vmem:[%s2918_s30 + $0x128] sm:$0xff] %v1600_v59 }
 0x518   : > { %1728 = vst [vmem:[%s2918_s30 + $0x130] sm:$0xff] %v1696_v28  ;;  %1729 = vst [vmem:[%s2918_s30 + $0x138] sm:$0xff] %v1697_v1  ;;  %v1559_v36 = vpop.permute.xlu1 %1558 }
 0x519   : > { %1629 = vst [vmem:[%s2918_s30 + $0x100] sm:$0xff] %v1597_v63  ;;  %1630 = vst [vmem:[%s2918_s30 + $0x108] sm:$0xff] %v1598_v24  ;;  %v1603_v39 = vsub.f32 %v1491_v60, %v1559_v36  ;;  %v1604_v37 = vsub.f32 %v1492_v48, %v1559_v36  ;;  %v1700_v47 = vsub.f32 %v1668_v55, %v1559_v36  ;;  %v1554_v50 = vpop.permute.xlu0 %1553 }
 0x51a   : > { %1726 = vst [vmem:[%s2918_s30 + $0x110] sm:$0xff] %v1694_v2  ;;  %1727 = vst [vmem:[%s2918_s30 + $0x118] sm:$0xff] %v1695_v51  ;;  %v1701_v58 = vsub.f32 %v1669_v49, %v1559_v36  ;;  %v1601_v6 = vsub.f32 %v1489_v8, %v1554_v50  ;;  %v1602_v10 = vsub.f32 %v1490_v25, %v1554_v50 }
 0x51b   : > { %v1698_v34 = vsub.f32 %v1666_v32, %v1554_v50  ;;  %v1699_v38 = vsub.f32 %v1667_v61, %v1554_v50  ;;  %1635 = vst [vmem:[%s2918_s30 + $0x160] sm:$0xff] %v1603_v39  ;;  %1636 = vst [vmem:[%s2918_s30 + $0x168] sm:$0xff] %v1604_v37 }
 0x51c   : > { %1732 = vst [vmem:[%s2918_s30 + $0x170] sm:$0xff] %v1700_v47  ;;  %1733 = vst [vmem:[%s2918_s30 + $0x178] sm:$0xff] %v1701_v58  ;;  %v1569_v12 = vpop.permute.xlu1 %1568 }
 0x51d   : > { %1633 = vst [vmem:[%s2918_s30 + $0x140] sm:$0xff] %v1601_v6  ;;  %1634 = vst [vmem:[%s2918_s30 + $0x148] sm:$0xff] %v1602_v10  ;;  %v1607_v11 = vsub.f32 %v1495_v3, %v1569_v12  ;;  %v1608_v16 = vsub.f32 %v1496_v9, %v1569_v12  ;;  %v1704_v13 = vsub.f32 %v1672_v18, %v1569_v12  ;;  %v1564_v62 = vpop.permute.xlu0 %1563 }
 0x51e   : > { %1730 = vst [vmem:[%s2918_s30 + $0x150] sm:$0xff] %v1698_v34  ;;  %1731 = vst [vmem:[%s2918_s30 + $0x158] sm:$0xff] %v1699_v38  ;;  %v1705_v46 = vsub.f32 %v1673_v35, %v1569_v12  ;;  %v1605_v4 = vsub.f32 %v1493_v45, %v1564_v62  ;;  %v1606_v20 = vsub.f32 %v1494_v7, %v1564_v62 }
 0x51f   : > { %v1702_v0 = vsub.f32 %v1670_v19, %v1564_v62  ;;  %v1703_v5 = vsub.f32 %v1671_v23, %v1564_v62  ;;  %1639 = vst [vmem:[%s2918_s30 + $0x1a0] sm:$0xff] %v1607_v11  ;;  %1640 = vst [vmem:[%s2918_s30 + $0x1a8] sm:$0xff] %v1608_v16 }
 0x520   : > { %1736 = vst [vmem:[%s2918_s30 + $0x1b0] sm:$0xff] %v1704_v13  ;;  %1737 = vst [vmem:[%s2918_s30 + $0x1b8] sm:$0xff] %v1705_v46  ;;  %v1579_v21 = vpop.permute.xlu1 %1578 }
 0x521   : > { %1637 = vst [vmem:[%s2918_s30 + $0x180] sm:$0xff] %v1605_v4  ;;  %1638 = vst [vmem:[%s2918_s30 + $0x188] sm:$0xff] %v1606_v20  ;;  %v1611_v26 = vsub.f32 %v1499_v52, %v1579_v21  ;;  %v1612_v44 = vsub.f32 %v1500_v14, %v1579_v21  ;;  %v1708_v53 = vsub.f32 %v1676_v17, %v1579_v21  ;;  %v1574_v43 = vpop.permute.xlu0 %1573 }
 0x522   : > { %1734 = vst [vmem:[%s2918_s30 + $0x190] sm:$0xff] %v1702_v0  ;;  %1735 = vst [vmem:[%s2918_s30 + $0x198] sm:$0xff] %v1703_v5  ;;  %v1709_v31 = vsub.f32 %v1677_v41, %v1579_v21  ;;  %v1609_v56 = vsub.f32 %v1497_v42, %v1574_v43  ;;  %v1610_v54 = vsub.f32 %v1498_v22, %v1574_v43 }
 0x523   : > { %v1706_v57 = vsub.f32 %v1674_v29, %v1574_v43  ;;  %v1707_v27 = vsub.f32 %v1675_v33, %v1574_v43  ;;  %1643 = vst [vmem:[%s2918_s30 + $0x1e0] sm:$0xff] %v1611_v26  ;;  %1644 = vst [vmem:[%s2918_s30 + $0x1e8] sm:$0xff] %v1612_v44 }
 0x524   : > { %1740 = vst [vmem:[%s2918_s30 + $0x1f0] sm:$0xff] %v1708_v53  ;;  %1741 = vst [vmem:[%s2918_s30 + $0x1f8] sm:$0xff] %v1709_v31 }
 0x525   : > { %1641 = vst [vmem:[%s2918_s30 + $0x1c0] sm:$0xff] %v1609_v56  ;;  %1642 = vst [vmem:[%s2918_s30 + $0x1c8] sm:$0xff] %v1610_v54 }
 0x526   : > { %1738 = vst [vmem:[%s2918_s30 + $0x1d0] sm:$0xff] %v1706_v57  ;;  %1739 = vst [vmem:[%s2918_s30 + $0x1d8] sm:$0xff] %v1707_v27 }
 0x527 PF: > { %s1947_s24 = sshll.u32 %s2567_s25, 13  ;;  %s1757_s14 = sshll.u32 %s2918_s30, 4  ;;  %s3560_s14 = int_to_ptr.vmem [resolvable:$true] %s1757_s14 }
 0x528   : > { %s3557_s0 = scalar_lea.hbm %s3628_s5, %s1947_s24  ;;  %s1743_s23 = scalar_lea.sflag [#allocation8], %s2890_s17 }
 0x529   : > { %s2449_s12 = scalar_lea.vmem %s3560_s14, 8192  ;;  %p3742_p1 = scmp.ne.s32.totalorder %s3681_s9, 0 }
 0x52a   : > { %p2450_p4 = scmp.ne.s32.totalorder %s3560_s14, %s2449_s12  ;;  %s2593_s18 = smov [#allocation12]  }
 0x52b   : > { %s2453_s8 = sshll.u32 %s2593_s18, 4  ;;  %s2454_s8 = int_to_ptr.vmem [resolvable:$false] %s2453_s8 }
 0x52c   : > { %p2451_p2 = pnand %p2450_p4, %p3742_p1  ;;  %s2455_s25 = scalar_lea.vmem %s2454_s8, 16384 }
 0x52d   : > { %p2456_p10 = scmp.lt.s32.totalorder %s3560_s14, %s2454_s8  ;;  %p2457_p6 = scmp.lt.s32.totalorder %s2455_s25, %s2449_s12 }
 0x52e   : > { %p2452_p0 = pneg %p2451_p2 }
 0x52f   : > { %p2458_p13 = por %p2457_p6, %p2456_p10 }
 0x531   : > { %p2459_p8 = pnand %p2458_p13, %p2452_p0 }
 0x533   : > { %2462 = shalt.err (!%p2459_p8)
}
 0x534   : > { %s2463_s15 = scalar_lea.hbm %s3557_s0, 8192  ;;  %s2467_s27 = scalar_lea.hbm %s3628_s5, 16384 }
 0x535   : > { %p2464_p11 = scmp.ne.s32.totalorder %s3557_s0, %s2463_s15  ;;  %p2468_p12 = scmp.lt.u32.totalorder %s3557_s0, %s3628_s5 }
 0x536   : > { %p2469_p5 = scmp.lt.u32.totalorder %s2467_s27, %s2463_s15  ;;  %p2471_p4 = scmp.lt.u32.totalorder %s2463_s15, %s3557_s0 }
 0x537   : > { %p2465_p7 = pnand %p2464_p11, %p3742_p1 }
 0x538   : > { %p2470_p3 = por %p2469_p5, %p2468_p12 }
 0x539   : > { %p2466_p9 = pneg %p2465_p7 }
 0x53a   : > { %p2472_p2 = por %p2471_p4, %p2470_p3 }
 0x53c   : > { %p2473_p0 = pnand %p2472_p2, %p2466_p9 }
 0x53e   : > { %2476 = shalt.err (!%p2473_p0)
}
 0x53f   : > { %s2594_s20 = smov 512   ;;  %s2595_s21 = smov 32  }
 0x540   : > { %2036 = dma.vmem_to_hbm [thread:$0]  (%p3742_p1), %s3560_s14, 8192, %s3557_s0, %s1743_s23, %s2594_s20, %s2594_s20, %s2595_s21  }
 0x541 PF: > { %s3743_s26 = sld [smem:[#allocation18_spill]]  ;;  %s3744_s11 = sld [smem:[#allocation26_spill]] }
 0x542   : > { %p2056_p10 = scmp.ge.s32.totalorder %s2579_s28, 2 }
 0x547   : > { %s1772_s10 = sand.u32 1, %s3743_s26   ;;  %p3745_p6 = scmp.ne.s32.totalorder %s3744_s11, 0 }
 0x548   : > { %s1773_s24 = scalar_lea.sflag [#allocation8], %s1772_s10 }
 0x549   : > { %p2050_p13 = pnand %p2056_p10, %p3745_p6 }
 0x54b   : > { %2534 = dma.done.wait (!%p2050_p13), %s1773_s24, 8192  }
 0x54c   : > { %2536 = vsyncadd (!%p2050_p13), %s1773_s24, 4294959104  ;;  %s22_s28 = sadd.s32 1, %s2579_s28   ;;  %s3746_s13 = sld [smem:[#allocation17_spill]] }
 0x54d   : > { %p19_p8 = scmp.ge.s32.totalorder %s22_s28, 6   ;;  %s3747_s20 = sld [smem:[#allocation25_spill]] }
 0x54e   : > { %s3748_s9 = sld [smem:[#allocation19_spill]]  ;;  %s3749_s23 = sld [smem:[#allocation24_spill]] }
 0x54f   : > { %s3750_s24 = sld [smem:[#allocation20_spill]]  ;;  %s3751_s25 = sld [smem:[#allocation21_spill]] }
 0x550   : > { %s3752_s26 = sld [smem:[#allocation22_spill]]  ;;  %s3753_s27 = sld [smem:[#allocation23_spill]] }
 0x551   : > { %s3754_s18 = smov %s2543_s19  ;;  %s3756_s21 = smov %s2555_s22 }
 0x552   : > { %s3755_s19 = smov %s3746_s13  ;;  %21 = sbr.rel (!%p19_p8) target bundleno = 12 (0xc), region = 113 }
 0x554   : > { %s3757_s22 = smov %s3748_s9 }
 0x559   :  { %1778 = vsyncpa [#allocation7], 1 }
 0x55a   :  { %1780 = vsyncpa [#allocation7 + $0x1], 1 }
 0x55b   :  { %1781 = vsyncpa [#allocation10], 1 }
 0x55c   :  { %1782 = vsyncpa [#allocation8], 1 }
 0x55d   :  { %1784 = vsyncpa [#allocation8 + $0x1], 1 }

</bundles_post_ra>
